<compile_context>
chip_gen: v7x
topology: tpu7x:2x2x1
jax: 0.10.0
libtpu: 0.0.40
codegen_flags: <defaults>
</compile_context>

<pallas_src>
import functools

import jax
import jax.numpy as jnp
from jax import lax
from jax.experimental import pallas as pl
from jax.experimental.pallas import tpu as pltpu


# ------------------------- fused conv x3 + maxpool kernel -------------------------

def _three_conv_kernel(x_ref, w1_ref, b1_ref, w2_ref, b2_ref, w3_ref, b3_ref,
                       o_ref, pad_ref, *, H, W, Cin, Cout):
    # x_ref:   (1, Cin, H*W)        NCHW image, spatial flattened (lane-dense)
    # w*_ref:  (9, Cout, Cin_l)     BN-folded conv weights, tap t = dy*3 + dx
    # b*_ref:  (Cout, 1)            BN-folded bias (broadcasts along lanes)
    # o_ref:   (1, Cout, Hp*Wp)     pooled output, NCHW-flat
    # pad_ref: VMEM (Cmax, (H+2)*(W+2)) zero-padded channels-major activation scratch
    Wp2 = W + 2
    L = (H - 1) * Wp2 + W              # contiguous flat range covering every interior pixel
    Hp, Wp = H // 2, W // 2
    HpWp = Hp * Wp
    L2 = L - Wp2 - 1
    f32 = jnp.float32

    # Per-step clear of the padded scratch (~2.5 vregs in this compact layout).  Must be
    # per-step: with dimension_semantics=("parallel",) each TensorCore owns its own
    # scratch instance, so a program_id==0 gate would leave one core uninitialised.
    pad_ref[...] = jnp.zeros_like(pad_ref)

    # Interior-column mask over the conv-output range q in [0, L): q = h*(W+2) + w; the
    # two lanes per row with w in {W, W+1} are the zero-pad columns separating image
    # rows.  Forcing them to 0 on write-back keeps the next layer's zero halo exact.
    lane = lax.broadcasted_iota(jnp.int32, (1, Wp2), 1)
    row_mask = (lane < W).astype(f32)                               # [1]*W + [0, 0]
    interior = jnp.concatenate([row_mask] * H, axis=-1)[:, :L]      # (1, L)

    def conv_bn_relu(w_ref, b_ref, c_in):
        # 3x3 'same' conv = 9 accumulated MXU dots (Cout, c_in) x (c_in, L); each tap is
        # a contiguous lane-offset window of the padded scratch (no lane concatenate).
        acc = None
        for dy in range(3):
            for dx in range(3):
                off = dy * Wp2 + dx
                tap = pad_ref[0:c_in, off:off + L]                  # (c_in, L)
                part = jnp.dot(w_ref[dy * 3 + dx], tap,
                               preferred_element_type=f32)          # (Cout, L)
                acc = part if acc is None else acc + part
        return jnp.maximum(acc + b_ref[...], 0.0)                   # folded-BN bias + ReLU

    # ---- layer 1: scatter the NCHW image rows into the padded scratch ----
    x2 = x_ref[0]                                                   # (Cin, H*W)
    for h in range(H):
        dst = (h + 1) * Wp2 + 1
        pad_ref[0:Cin, dst:dst + W] = x2[:, h * W:(h + 1) * W]
    y = conv_bn_relu(w1_ref, b1_ref, Cin)

    # ---- layers 2 & 3: inter-layer activations never leave VMEM ----
    pad_ref[0:Cout, Wp2 + 1:Wp2 + 1 + L] = y * interior
    y = conv_bn_relu(w2_ref, b2_ref, Cout)
    pad_ref[0:Cout, Wp2 + 1:Wp2 + 1 + L] = y * interior
    y = conv_bn_relu(w3_ref, b3_ref, Cout)

    # ---- fused 2x2 / stride-2 max-pool (all on the register value, no pool scratch) ----
    mw = jnp.maximum(y[:, :L - 1], y[:, 1:])                        # horizontal pair max
    mhw = jnp.maximum(mw[:, :L2], mw[:, Wp2:])                      # + vertical pair max
    # Keep the top-left corner of every 2x2 block: a stride-2 lane gather expressed as a
    # single MXU matmul with a one-hot selection matrix (built without vector int div).
    j = lax.broadcasted_iota(jnp.int32, (1, HpWp), 1)               # j = ph*Wp + pw
    ph = sum(((j >= k * Wp).astype(jnp.int32)) for k in range(1, Hp))   # floor(j / Wp)
    want = 2 * j + 2 * (Wp2 - Wp) * ph                              # q = 2*ph*Wp2 + 2*pw
    q = lax.broadcasted_iota(jnp.int32, (L2, HpWp), 0)
    sel = (q == want).astype(f32)                                   # (L2, Hp*Wp) one-hot
    o_ref[0] = jnp.dot(mhw, sel, preferred_element_type=f32)        # (Cout, Hp*Wp)


# ------------------------------ host-side wrapper ---------------------------------

def _fold_bn(p, eps):
    """Fold eval-mode BN (+ conv bias) into the conv weights / a single (Cout,1) bias."""
    c_out, c_in = p["w"].shape[0], p["w"].shape[1]
    s = p["gamma"] * lax.rsqrt(p["var"] + eps)                      # (Cout,)
    w = p["w"] * s[:, None, None, None]                             # (Cout, Cin, 3, 3)
    w_taps = jnp.transpose(w.reshape(c_out, c_in, 9), (2, 0, 1))    # (9, Cout, Cin)
    b = ((p["b"] - p["mean"]) * s + p["beta"]).reshape(c_out, 1)    # (Cout, 1)
    return w_taps.astype(jnp.float32), b.astype(jnp.float32)


def three_conv_forward(x_nchw, params, eps=1e-5):
    """ThreeConv forward.  Input/Output NCHW (PyTorch convention), no wrapper transposes."""
    x = jnp.asarray(x_nchw, jnp.float32)
    n, c_in, h, w = x.shape
    c_out = params[0]["w"].shape[0]
    assert h % 2 == 0 and w % 2 == 0, "fused 2x2 pool assumes even spatial dims"
    hp, wp = h // 2, w // 2
    c_max = max(c_in, c_out)
    p_flat = (h + 2) * (w + 2)

    (w1, b1), (w2, b2), (w3, b3) = (_fold_bn(p, eps) for p in params)

    x_flat = x.reshape(n, c_in, h * w)            # metadata-only reshape (stays NCHW)

    kern = functools.partial(_three_conv_kernel, H=h, W=w, Cin=c_in, Cout=c_out)

    flops = 2 * n * h * w * 9 * (c_in * c_out + 2 * c_out * c_out)
    bytes_accessed = 4 * (x_flat.size + w1.size + w2.size + w3.size
                          + b1.size + b2.size + b3.size + n * c_out * hp * wp)

    out = pl.pallas_call(
        kern,
        out_shape=jax.ShapeDtypeStruct((n, c_out, hp * wp), jnp.float32),
        grid_spec=pltpu.PrefetchScalarGridSpec(
            num_scalar_prefetch=0,
            grid=(n,),
            in_specs=[
                pl.BlockSpec((1, c_in, h * w), lambda i: (i, 0, 0)),
                pl.BlockSpec(w1.shape, lambda i: (0, 0, 0)),
                pl.BlockSpec(b1.shape, lambda i: (0, 0)),
                pl.BlockSpec(w2.shape, lambda i: (0, 0, 0)),
                pl.BlockSpec(b2.shape, lambda i: (0, 0)),
                pl.BlockSpec(w3.shape, lambda i: (0, 0, 0)),
                pl.BlockSpec(b3.shape, lambda i: (0, 0)),
            ],
            out_specs=pl.BlockSpec((1, c_out, hp * wp), lambda i: (i, 0, 0)),
            scratch_shapes=[
                pltpu.VMEM((c_max, p_flat), jnp.float32),   # padded channels-major scratch
            ],
        ),
        compiler_params=pltpu.CompilerParams(
            dimension_semantics=("parallel",)),
        cost_estimate=pl.CostEstimate(flops=flops, transcendentals=0,
                                      bytes_accessed=bytes_accessed),
    )(x_flat, w1, b1, w2, b2, w3, b3)

    return out.reshape(n, c_out, hp, wp)          # metadata-only reshape (NCHW)


# -------------------------------- parameters ---------------------------------------

def init_params(key, in_channels, out_channels):
    """Deterministic synthetic parameters (3x conv OIHW + BN layers), PyTorch layout."""
    params = []
    c_in = in_channels
    for _ in range(3):
        key, k1, k2, k3, k4, k5, k6 = jax.random.split(key, 7)
        params.append(dict(
            w=0.2 * jax.random.normal(k1, (out_channels, c_in, 3, 3), jnp.float32),
            b=0.1 * jax.random.normal(k2, (out_channels,), jnp.float32),
            gamma=1.0 + 0.1 * jax.random.normal(k3, (out_channels,), jnp.float32),
            beta=0.1 * jax.random.normal(k4, (out_channels,), jnp.float32),
            mean=0.1 * jax.random.normal(k5, (out_channels,), jnp.float32),
            var=jax.random.uniform(k6, (out_channels,), jnp.float32, 0.5, 1.5),
        ))
        c_in = out_channels
    return params


# -------------------------------- pure-JAX ref --------------------------------------

def ref_forward(x_nchw, params, eps=1e-5):
    x = x_nchw
    for p in params:
        y = lax.conv_general_dilated(
            x, p["w"], window_strides=(1, 1), padding=((1, 1), (1, 1)),
            dimension_numbers=("NCHW", "OIHW", "NCHW"))
        y = y + p["b"][None, :, None, None]
        s = (p["gamma"] * lax.rsqrt(p["var"] + eps))[None, :, None, None]
        y = (y - p["mean"][None, :, None, None]) * s + p["beta"][None, :, None, None]
        x = jnp.maximum(y, 0.0)
    x = lax.reduce_window(x, -jnp.inf, lax.max,
                          (1, 1, 2, 2), (1, 1, 2, 2), "VALID")
    return x


if __name__ == "__main__":
    key = jax.random.PRNGKey(0)
    kx, kp = jax.random.split(key)

    in_channels, out_channels = 4, 8
    x = jax.random.normal(kx, (2, in_channels, 16, 16), jnp.float32)  # NCHW
    params = init_params(kp, in_channels, out_channels)

    out = jax.block_until_ready(three_conv_forward(x, params))
    ref = jax.block_until_ready(ref_forward(x, params))

    assert out.shape == (2, out_channels, 8, 8), out.shape
    assert jnp.allclose(out, ref, atol=1e-4, rtol=1e-4), \
        float(jnp.max(jnp.abs(out - ref)))
    print("KERNEL_OK")
</pallas_src>

<mosaic_0001>
module attributes {stable_mosaic.version = 11 : i64} {
  func.func @_three_conv_kernel(%arg0: i32, %arg1: memref<1x4x256xf32, #tpu.memory_space<vmem>>, %arg2: memref<9x8x4xf32, #tpu.memory_space<vmem>>, %arg3: memref<8x1xf32, #tpu.memory_space<vmem>>, %arg4: memref<9x8x8xf32, #tpu.memory_space<vmem>>, %arg5: memref<8x1xf32, #tpu.memory_space<vmem>>, %arg6: memref<9x8x8xf32, #tpu.memory_space<vmem>>, %arg7: memref<8x1xf32, #tpu.memory_space<vmem>>, %arg8: memref<1x8x64xf32, #tpu.memory_space<vmem>>, %arg9: memref<8x324xf32, #tpu.memory_space<vmem>>) attributes {dimension_semantics = [#tpu.dimension_semantics<parallel>], iteration_bounds = array<i64: 2>, scalar_prefetch = 0 : i64, scratch_operands = 1 : i64, tpu.core_type = #tpu.core_type<tc>, window_params = [{transform_indices = @transform_0, window_bounds = array<i64: 1, 4, 256>}, {pipeline_mode = #tpu.pipeline_mode<synchronous>, transform_indices = @transform_1, window_bounds = array<i64: 9, 8, 4>}, {pipeline_mode = #tpu.pipeline_mode<synchronous>, transform_indices = @transform_2, window_bounds = array<i64: 8, 1>}, {pipeline_mode = #tpu.pipeline_mode<synchronous>, transform_indices = @transform_3, window_bounds = array<i64: 9, 8, 8>}, {pipeline_mode = #tpu.pipeline_mode<synchronous>, transform_indices = @transform_4, window_bounds = array<i64: 8, 1>}, {pipeline_mode = #tpu.pipeline_mode<synchronous>, transform_indices = @transform_5, window_bounds = array<i64: 9, 8, 8>}, {pipeline_mode = #tpu.pipeline_mode<synchronous>, transform_indices = @transform_6, window_bounds = array<i64: 8, 1>}, {transform_indices = @transform_7, window_bounds = array<i64: 1, 8, 64>}]} {
    %cst = arith.constant 0.000000e+00 : f32
    %0 = vector.broadcast %cst : f32 to vector<8x324xf32>
    %c0 = arith.constant 0 : index
    %c0_0 = arith.constant 0 : index
    %1 = vector.load %arg9[%c0, %c0_0] : memref<8x324xf32, #tpu.memory_space<vmem>>, vector<8x324xf32>
    tpu.vector_store %arg9[%c0, %c0_0], %0 {strides = array<i32>} : memref<8x324xf32, #tpu.memory_space<vmem>>, vector<8x324xf32>,
    %2 = tpu.iota {dimensions = array<i32: 1>} : vector<1x18xi32>
    %c16_i32 = arith.constant 16 : i32
    %3 = vector.broadcast %c16_i32 : i32 to vector<1x18xi32>
    %4 = arith.cmpi slt, %2, %3 : vector<1x18xi32>
    %5 = arith.extui %4 : vector<1x18xi1> to vector<1x18xi32>
    %6 = arith.sitofp %5 : vector<1x18xi32> to vector<1x18xf32>
    %7 = tpu.concatenate %6, %6, %6, %6, %6, %6, %6, %6, %6, %6, %6, %6, %6, %6, %6, %6 in 1 : vector<1x18xf32>, vector<1x18xf32>, vector<1x18xf32>, vector<1x18xf32>, vector<1x18xf32>, vector<1x18xf32>, vector<1x18xf32>, vector<1x18xf32>, vector<1x18xf32>, vector<1x18xf32>, vector<1x18xf32>, vector<1x18xf32>, vector<1x18xf32>, vector<1x18xf32>, vector<1x18xf32>, vector<1x18xf32> -> vector<1x288xf32>
    %8 = vector.extract_strided_slice %7 {offsets = [0, 0], sizes = [1, 286], strides = [1, 1]} : vector<1x288xf32> to vector<1x286xf32>
    %c0_1 = arith.constant 0 : index
    %c0_2 = arith.constant 0 : index
    %c0_3 = arith.constant 0 : index
    %9 = vector.load %arg1[%c0_1, %c0_2, %c0_3] : memref<1x4x256xf32, #tpu.memory_space<vmem>>, vector<1x4x256xf32>
    %10 = vector.shape_cast %9 : vector<1x4x256xf32> to vector<4x256xf32>
    %11 = vector.extract_strided_slice %10 {offsets = [0, 0], sizes = [4, 16], strides = [1, 1]} : vector<4x256xf32> to vector<4x16xf32>
    %c0_4 = arith.constant 0 : index
    %c19 = arith.constant 19 : index
    %12 = vector.load %arg9[%c0_4, %c19] : memref<8x324xf32, #tpu.memory_space<vmem>>, vector<4x16xf32>
    tpu.vector_store %arg9[%c0_4, %c19], %11 {strides = array<i32>} : memref<8x324xf32, #tpu.memory_space<vmem>>, vector<4x16xf32>,
    %13 = vector.extract_strided_slice %10 {offsets = [0, 16], sizes = [4, 16], strides = [1, 1]} : vector<4x256xf32> to vector<4x16xf32>
    %c0_5 = arith.constant 0 : index
    %c37 = arith.constant 37 : index
    %14 = vector.load %arg9[%c0_5, %c37] : memref<8x324xf32, #tpu.memory_space<vmem>>, vector<4x16xf32>
    tpu.vector_store %arg9[%c0_5, %c37], %13 {strides = array<i32>} : memref<8x324xf32, #tpu.memory_space<vmem>>, vector<4x16xf32>,
    %15 = vector.extract_strided_slice %10 {offsets = [0, 32], sizes = [4, 16], strides = [1, 1]} : vector<4x256xf32> to vector<4x16xf32>
    %c0_6 = arith.constant 0 : index
    %c55 = arith.constant 55 : index
    %16 = vector.load %arg9[%c0_6, %c55] : memref<8x324xf32, #tpu.memory_space<vmem>>, vector<4x16xf32>
    tpu.vector_store %arg9[%c0_6, %c55], %15 {strides = array<i32>} : memref<8x324xf32, #tpu.memory_space<vmem>>, vector<4x16xf32>,
    %17 = vector.extract_strided_slice %10 {offsets = [0, 48], sizes = [4, 16], strides = [1, 1]} : vector<4x256xf32> to vector<4x16xf32>
    %c0_7 = arith.constant 0 : index
    %c73 = arith.constant 73 : index
    %18 = vector.load %arg9[%c0_7, %c73] : memref<8x324xf32, #tpu.memory_space<vmem>>, vector<4x16xf32>
    tpu.vector_store %arg9[%c0_7, %c73], %17 {strides = array<i32>} : memref<8x324xf32, #tpu.memory_space<vmem>>, vector<4x16xf32>,
    %19 = vector.extract_strided_slice %10 {offsets = [0, 64], sizes = [4, 16], strides = [1, 1]} : vector<4x256xf32> to vector<4x16xf32>
    %c0_8 = arith.constant 0 : index
    %c91 = arith.constant 91 : index
    %20 = vector.load %arg9[%c0_8, %c91] : memref<8x324xf32, #tpu.memory_space<vmem>>, vector<4x16xf32>
    tpu.vector_store %arg9[%c0_8, %c91], %19 {strides = array<i32>} : memref<8x324xf32, #tpu.memory_space<vmem>>, vector<4x16xf32>,
    %21 = vector.extract_strided_slice %10 {offsets = [0, 80], sizes = [4, 16], strides = [1, 1]} : vector<4x256xf32> to vector<4x16xf32>
    %c0_9 = arith.constant 0 : index
    %c109 = arith.constant 109 : index
    %22 = vector.load %arg9[%c0_9, %c109] : memref<8x324xf32, #tpu.memory_space<vmem>>, vector<4x16xf32>
    tpu.vector_store %arg9[%c0_9, %c109], %21 {strides = array<i32>} : memref<8x324xf32, #tpu.memory_space<vmem>>, vector<4x16xf32>,
    %23 = vector.extract_strided_slice %10 {offsets = [0, 96], sizes = [4, 16], strides = [1, 1]} : vector<4x256xf32> to vector<4x16xf32>
    %c0_10 = arith.constant 0 : index
    %c127 = arith.constant 127 : index
    %24 = vector.load %arg9[%c0_10, %c127] : memref<8x324xf32, #tpu.memory_space<vmem>>, vector<4x16xf32>
    tpu.vector_store %arg9[%c0_10, %c127], %23 {strides = array<i32>} : memref<8x324xf32, #tpu.memory_space<vmem>>, vector<4x16xf32>,
    %25 = vector.extract_strided_slice %10 {offsets = [0, 112], sizes = [4, 16], strides = [1, 1]} : vector<4x256xf32> to vector<4x16xf32>
    %c0_11 = arith.constant 0 : index
    %c145 = arith.constant 145 : index
    %26 = vector.load %arg9[%c0_11, %c145] : memref<8x324xf32, #tpu.memory_space<vmem>>, vector<4x16xf32>
    tpu.vector_store %arg9[%c0_11, %c145], %25 {strides = array<i32>} : memref<8x324xf32, #tpu.memory_space<vmem>>, vector<4x16xf32>,
    %27 = vector.extract_strided_slice %10 {offsets = [0, 128], sizes = [4, 16], strides = [1, 1]} : vector<4x256xf32> to vector<4x16xf32>
    %c0_12 = arith.constant 0 : index
    %c163 = arith.constant 163 : index
    %28 = vector.load %arg9[%c0_12, %c163] : memref<8x324xf32, #tpu.memory_space<vmem>>, vector<4x16xf32>
    tpu.vector_store %arg9[%c0_12, %c163], %27 {strides = array<i32>} : memref<8x324xf32, #tpu.memory_space<vmem>>, vector<4x16xf32>,
    %29 = vector.extract_strided_slice %10 {offsets = [0, 144], sizes = [4, 16], strides = [1, 1]} : vector<4x256xf32> to vector<4x16xf32>
    %c0_13 = arith.constant 0 : index
    %c181 = arith.constant 181 : index
    %30 = vector.load %arg9[%c0_13, %c181] : memref<8x324xf32, #tpu.memory_space<vmem>>, vector<4x16xf32>
    tpu.vector_store %arg9[%c0_13, %c181], %29 {strides = array<i32>} : memref<8x324xf32, #tpu.memory_space<vmem>>, vector<4x16xf32>,
    %31 = vector.extract_strided_slice %10 {offsets = [0, 160], sizes = [4, 16], strides = [1, 1]} : vector<4x256xf32> to vector<4x16xf32>
    %c0_14 = arith.constant 0 : index
    %c199 = arith.constant 199 : index
    %32 = vector.load %arg9[%c0_14, %c199] : memref<8x324xf32, #tpu.memory_space<vmem>>, vector<4x16xf32>
    tpu.vector_store %arg9[%c0_14, %c199], %31 {strides = array<i32>} : memref<8x324xf32, #tpu.memory_space<vmem>>, vector<4x16xf32>,
    %33 = vector.extract_strided_slice %10 {offsets = [0, 176], sizes = [4, 16], strides = [1, 1]} : vector<4x256xf32> to vector<4x16xf32>
    %c0_15 = arith.constant 0 : index
    %c217 = arith.constant 217 : index
    %34 = vector.load %arg9[%c0_15, %c217] : memref<8x324xf32, #tpu.memory_space<vmem>>, vector<4x16xf32>
    tpu.vector_store %arg9[%c0_15, %c217], %33 {strides = array<i32>} : memref<8x324xf32, #tpu.memory_space<vmem>>, vector<4x16xf32>,
    %35 = vector.extract_strided_slice %10 {offsets = [0, 192], sizes = [4, 16], strides = [1, 1]} : vector<4x256xf32> to vector<4x16xf32>
    %c0_16 = arith.constant 0 : index
    %c235 = arith.constant 235 : index
    %36 = vector.load %arg9[%c0_16, %c235] : memref<8x324xf32, #tpu.memory_space<vmem>>, vector<4x16xf32>
    tpu.vector_store %arg9[%c0_16, %c235], %35 {strides = array<i32>} : memref<8x324xf32, #tpu.memory_space<vmem>>, vector<4x16xf32>,
    %37 = vector.extract_strided_slice %10 {offsets = [0, 208], sizes = [4, 16], strides = [1, 1]} : vector<4x256xf32> to vector<4x16xf32>
    %c0_17 = arith.constant 0 : index
    %c253 = arith.constant 253 : index
    %38 = vector.load %arg9[%c0_17, %c253] : memref<8x324xf32, #tpu.memory_space<vmem>>, vector<4x16xf32>
    tpu.vector_store %arg9[%c0_17, %c253], %37 {strides = array<i32>} : memref<8x324xf32, #tpu.memory_space<vmem>>, vector<4x16xf32>,
    %39 = vector.extract_strided_slice %10 {offsets = [0, 224], sizes = [4, 16], strides = [1, 1]} : vector<4x256xf32> to vector<4x16xf32>
    %c0_18 = arith.constant 0 : index
    %c271 = arith.constant 271 : index
    %40 = vector.load %arg9[%c0_18, %c271] : memref<8x324xf32, #tpu.memory_space<vmem>>, vector<4x16xf32>
    tpu.vector_store %arg9[%c0_18, %c271], %39 {strides = array<i32>} : memref<8x324xf32, #tpu.memory_space<vmem>>, vector<4x16xf32>,
    %41 = vector.extract_strided_slice %10 {offsets = [0, 240], sizes = [4, 16], strides = [1, 1]} : vector<4x256xf32> to vector<4x16xf32>
    %c0_19 = arith.constant 0 : index
    %c289 = arith.constant 289 : index
    %42 = vector.load %arg9[%c0_19, %c289] : memref<8x324xf32, #tpu.memory_space<vmem>>, vector<4x16xf32>
    tpu.vector_store %arg9[%c0_19, %c289], %41 {strides = array<i32>} : memref<8x324xf32, #tpu.memory_space<vmem>>, vector<4x16xf32>,
    %c0_20 = arith.constant 0 : index
    %c0_21 = arith.constant 0 : index
    %43 = vector.load %arg9[%c0_20, %c0_21] : memref<8x324xf32, #tpu.memory_space<vmem>>, vector<4x286xf32>
    %c0_22 = arith.constant 0 : index
    %c0_23 = arith.constant 0 : index
    %c0_24 = arith.constant 0 : index
    %44 = vector.load %arg2[%c0_22, %c0_23, %c0_24] : memref<9x8x4xf32, #tpu.memory_space<vmem>>, vector<1x8x4xf32>
    %45 = vector.shape_cast %44 : vector<1x8x4xf32> to vector<8x4xf32>
    %cst_25 = arith.constant dense<0.000000e+00> : vector<8x286xf32>
    %46 = tpu.matmul %45, %43, %cst_25 {dimension_numbers = #tpu.dot_dimension_numbers<[1], [0], [0], [1], [0, 0, 1, 1], [], []>} : vector<8x4xf32>, vector<4x286xf32>, vector<8x286xf32> -> vector<8x286xf32>
    %c0_26 = arith.constant 0 : index
    %c1 = arith.constant 1 : index
    %47 = vector.load %arg9[%c0_26, %c1] : memref<8x324xf32, #tpu.memory_space<vmem>>, vector<4x286xf32>
    %c1_27 = arith.constant 1 : index
    %c0_28 = arith.constant 0 : index
    %c0_29 = arith.constant 0 : index
    %48 = vector.load %arg2[%c1_27, %c0_28, %c0_29] : memref<9x8x4xf32, #tpu.memory_space<vmem>>, vector<1x8x4xf32>
    %49 = vector.shape_cast %48 : vector<1x8x4xf32> to vector<8x4xf32>
    %cst_30 = arith.constant dense<0.000000e+00> : vector<8x286xf32>
    %50 = tpu.matmul %49, %47, %cst_30 {dimension_numbers = #tpu.dot_dimension_numbers<[1], [0], [0], [1], [0, 0, 1, 1], [], []>} : vector<8x4xf32>, vector<4x286xf32>, vector<8x286xf32> -> vector<8x286xf32>
    %51 = arith.addf %46, %50 : vector<8x286xf32>
    %c0_31 = arith.constant 0 : index
    %c2 = arith.constant 2 : index
    %52 = vector.load %arg9[%c0_31, %c2] : memref<8x324xf32, #tpu.memory_space<vmem>>, vector<4x286xf32>
    %c2_32 = arith.constant 2 : index
    %c0_33 = arith.constant 0 : index
    %c0_34 = arith.constant 0 : index
    %53 = vector.load %arg2[%c2_32, %c0_33, %c0_34] : memref<9x8x4xf32, #tpu.memory_space<vmem>>, vector<1x8x4xf32>
    %54 = vector.shape_cast %53 : vector<1x8x4xf32> to vector<8x4xf32>
    %cst_35 = arith.constant dense<0.000000e+00> : vector<8x286xf32>
    %55 = tpu.matmul %54, %52, %cst_35 {dimension_numbers = #tpu.dot_dimension_numbers<[1], [0], [0], [1], [0, 0, 1, 1], [], []>} : vector<8x4xf32>, vector<4x286xf32>, vector<8x286xf32> -> vector<8x286xf32>
    %56 = arith.addf %51, %55 : vector<8x286xf32>
    %c0_36 = arith.constant 0 : index
    %c18 = arith.constant 18 : index
    %57 = vector.load %arg9[%c0_36, %c18] : memref<8x324xf32, #tpu.memory_space<vmem>>, vector<4x286xf32>
    %c3 = arith.constant 3 : index
    %c0_37 = arith.constant 0 : index
    %c0_38 = arith.constant 0 : index
    %58 = vector.load %arg2[%c3, %c0_37, %c0_38] : memref<9x8x4xf32, #tpu.memory_space<vmem>>, vector<1x8x4xf32>
    %59 = vector.shape_cast %58 : vector<1x8x4xf32> to vector<8x4xf32>
    %cst_39 = arith.constant dense<0.000000e+00> : vector<8x286xf32>
    %60 = tpu.matmul %59, %57, %cst_39 {dimension_numbers = #tpu.dot_dimension_numbers<[1], [0], [0], [1], [0, 0, 1, 1], [], []>} : vector<8x4xf32>, vector<4x286xf32>, vector<8x286xf32> -> vector<8x286xf32>
    %61 = arith.addf %56, %60 : vector<8x286xf32>
    %c0_40 = arith.constant 0 : index
    %c19_41 = arith.constant 19 : index
    %62 = vector.load %arg9[%c0_40, %c19_41] : memref<8x324xf32, #tpu.memory_space<vmem>>, vector<4x286xf32>
    %c4 = arith.constant 4 : index
    %c0_42 = arith.constant 0 : index
    %c0_43 = arith.constant 0 : index
    %63 = vector.load %arg2[%c4, %c0_42, %c0_43] : memref<9x8x4xf32, #tpu.memory_space<vmem>>, vector<1x8x4xf32>
    %64 = vector.shape_cast %63 : vector<1x8x4xf32> to vector<8x4xf32>
    %cst_44 = arith.constant dense<0.000000e+00> : vector<8x286xf32>
    %65 = tpu.matmul %64, %62, %cst_44 {dimension_numbers = #tpu.dot_dimension_numbers<[1], [0], [0], [1], [0, 0, 1, 1], [], []>} : vector<8x4xf32>, vector<4x286xf32>, vector<8x286xf32> -> vector<8x286xf32>
    %66 = arith.addf %61, %65 : vector<8x286xf32>
    %c0_45 = arith.constant 0 : index
    %c20 = arith.constant 20 : index
    %67 = vector.load %arg9[%c0_45, %c20] : memref<8x324xf32, #tpu.memory_space<vmem>>, vector<4x286xf32>
    %c5 = arith.constant 5 : index
    %c0_46 = arith.constant 0 : index
    %c0_47 = arith.constant 0 : index
    %68 = vector.load %arg2[%c5, %c0_46, %c0_47] : memref<9x8x4xf32, #tpu.memory_space<vmem>>, vector<1x8x4xf32>
    %69 = vector.shape_cast %68 : vector<1x8x4xf32> to vector<8x4xf32>
    %cst_48 = arith.constant dense<0.000000e+00> : vector<8x286xf32>
    %70 = tpu.matmul %69, %67, %cst_48 {dimension_numbers = #tpu.dot_dimension_numbers<[1], [0], [0], [1], [0, 0, 1, 1], [], []>} : vector<8x4xf32>, vector<4x286xf32>, vector<8x286xf32> -> vector<8x286xf32>
    %71 = arith.addf %66, %70 : vector<8x286xf32>
    %c0_49 = arith.constant 0 : index
    %c36 = arith.constant 36 : index
    %72 = vector.load %arg9[%c0_49, %c36] : memref<8x324xf32, #tpu.memory_space<vmem>>, vector<4x286xf32>
    %c6 = arith.constant 6 : index
    %c0_50 = arith.constant 0 : index
    %c0_51 = arith.constant 0 : index
    %73 = vector.load %arg2[%c6, %c0_50, %c0_51] : memref<9x8x4xf32, #tpu.memory_space<vmem>>, vector<1x8x4xf32>
    %74 = vector.shape_cast %73 : vector<1x8x4xf32> to vector<8x4xf32>
    %cst_52 = arith.constant dense<0.000000e+00> : vector<8x286xf32>
    %75 = tpu.matmul %74, %72, %cst_52 {dimension_numbers = #tpu.dot_dimension_numbers<[1], [0], [0], [1], [0, 0, 1, 1], [], []>} : vector<8x4xf32>, vector<4x286xf32>, vector<8x286xf32> -> vector<8x286xf32>
    %76 = arith.addf %71, %75 : vector<8x286xf32>
    %c0_53 = arith.constant 0 : index
    %c37_54 = arith.constant 37 : index
    %77 = vector.load %arg9[%c0_53, %c37_54] : memref<8x324xf32, #tpu.memory_space<vmem>>, vector<4x286xf32>
    %c7 = arith.constant 7 : index
    %c0_55 = arith.constant 0 : index
    %c0_56 = arith.constant 0 : index
    %78 = vector.load %arg2[%c7, %c0_55, %c0_56] : memref<9x8x4xf32, #tpu.memory_space<vmem>>, vector<1x8x4xf32>
    %79 = vector.shape_cast %78 : vector<1x8x4xf32> to vector<8x4xf32>
    %cst_57 = arith.constant dense<0.000000e+00> : vector<8x286xf32>
    %80 = tpu.matmul %79, %77, %cst_57 {dimension_numbers = #tpu.dot_dimension_numbers<[1], [0], [0], [1], [0, 0, 1, 1], [], []>} : vector<8x4xf32>, vector<4x286xf32>, vector<8x286xf32> -> vector<8x286xf32>
    %81 = arith.addf %76, %80 : vector<8x286xf32>
    %c0_58 = arith.constant 0 : index
    %c38 = arith.constant 38 : index
    %82 = vector.load %arg9[%c0_58, %c38] : memref<8x324xf32, #tpu.memory_space<vmem>>, vector<4x286xf32>
    %c8 = arith.constant 8 : index
    %c0_59 = arith.constant 0 : index
    %c0_60 = arith.constant 0 : index
    %83 = vector.load %arg2[%c8, %c0_59, %c0_60] : memref<9x8x4xf32, #tpu.memory_space<vmem>>, vector<1x8x4xf32>
    %84 = vector.shape_cast %83 : vector<1x8x4xf32> to vector<8x4xf32>
    %cst_61 = arith.constant dense<0.000000e+00> : vector<8x286xf32>
    %85 = tpu.matmul %84, %82, %cst_61 {dimension_numbers = #tpu.dot_dimension_numbers<[1], [0], [0], [1], [0, 0, 1, 1], [], []>} : vector<8x4xf32>, vector<4x286xf32>, vector<8x286xf32> -> vector<8x286xf32>
    %86 = arith.addf %81, %85 : vector<8x286xf32>
    %c0_62 = arith.constant 0 : index
    %c0_63 = arith.constant 0 : index
    %87 = vector.load %arg3[%c0_62, %c0_63] : memref<8x1xf32, #tpu.memory_space<vmem>>, vector<8x1xf32>
    %88 = vector.broadcast %87 : vector<8x1xf32> to vector<8x286xf32>
    %89 = arith.addf %86, %88 : vector<8x286xf32>
    %cst_64 = arith.constant 0.000000e+00 : f32
    %90 = vector.broadcast %cst_64 : f32 to vector<8x286xf32>
    %91 = arith.maximumf %89, %90 : vector<8x286xf32>
    %92 = vector.broadcast %8 : vector<1x286xf32> to vector<8x286xf32>
    %93 = arith.mulf %91, %92 : vector<8x286xf32>
    %c0_65 = arith.constant 0 : index
    %c19_66 = arith.constant 19 : index
    %94 = vector.load %arg9[%c0_65, %c19_66] : memref<8x324xf32, #tpu.memory_space<vmem>>, vector<8x286xf32>
    tpu.vector_store %arg9[%c0_65, %c19_66], %93 {strides = array<i32>} : memref<8x324xf32, #tpu.memory_space<vmem>>, vector<8x286xf32>,
    %c0_67 = arith.constant 0 : index
    %c0_68 = arith.constant 0 : index
    %95 = vector.load %arg9[%c0_67, %c0_68] : memref<8x324xf32, #tpu.memory_space<vmem>>, vector<8x286xf32>
    %c0_69 = arith.constant 0 : index
    %c0_70 = arith.constant 0 : index
    %c0_71 = arith.constant 0 : index
    %96 = vector.load %arg4[%c0_69, %c0_70, %c0_71] : memref<9x8x8xf32, #tpu.memory_space<vmem>>, vector<1x8x8xf32>
    %97 = vector.shape_cast %96 : vector<1x8x8xf32> to vector<8x8xf32>
    %cst_72 = arith.constant dense<0.000000e+00> : vector<8x286xf32>
    %98 = tpu.matmul %97, %95, %cst_72 {dimension_numbers = #tpu.dot_dimension_numbers<[1], [0], [0], [1], [0, 0, 1, 1], [], []>} : vector<8x8xf32>, vector<8x286xf32>, vector<8x286xf32> -> vector<8x286xf32>
    %c0_73 = arith.constant 0 : index
    %c1_74 = arith.constant 1 : index
    %99 = vector.load %arg9[%c0_73, %c1_74] : memref<8x324xf32, #tpu.memory_space<vmem>>, vector<8x286xf32>
    %c1_75 = arith.constant 1 : index
    %c0_76 = arith.constant 0 : index
    %c0_77 = arith.constant 0 : index
    %100 = vector.load %arg4[%c1_75, %c0_76, %c0_77] : memref<9x8x8xf32, #tpu.memory_space<vmem>>, vector<1x8x8xf32>
    %101 = vector.shape_cast %100 : vector<1x8x8xf32> to vector<8x8xf32>
    %cst_78 = arith.constant dense<0.000000e+00> : vector<8x286xf32>
    %102 = tpu.matmul %101, %99, %cst_78 {dimension_numbers = #tpu.dot_dimension_numbers<[1], [0], [0], [1], [0, 0, 1, 1], [], []>} : vector<8x8xf32>, vector<8x286xf32>, vector<8x286xf32> -> vector<8x286xf32>
    %103 = arith.addf %98, %102 : vector<8x286xf32>
    %c0_79 = arith.constant 0 : index
    %c2_80 = arith.constant 2 : index
    %104 = vector.load %arg9[%c0_79, %c2_80] : memref<8x324xf32, #tpu.memory_space<vmem>>, vector<8x286xf32>
    %c2_81 = arith.constant 2 : index
    %c0_82 = arith.constant 0 : index
    %c0_83 = arith.constant 0 : index
    %105 = vector.load %arg4[%c2_81, %c0_82, %c0_83] : memref<9x8x8xf32, #tpu.memory_space<vmem>>, vector<1x8x8xf32>
    %106 = vector.shape_cast %105 : vector<1x8x8xf32> to vector<8x8xf32>
    %cst_84 = arith.constant dense<0.000000e+00> : vector<8x286xf32>
    %107 = tpu.matmul %106, %104, %cst_84 {dimension_numbers = #tpu.dot_dimension_numbers<[1], [0], [0], [1], [0, 0, 1, 1], [], []>} : vector<8x8xf32>, vector<8x286xf32>, vector<8x286xf32> -> vector<8x286xf32>
    %108 = arith.addf %103, %107 : vector<8x286xf32>
    %c0_85 = arith.constant 0 : index
    %c18_86 = arith.constant 18 : index
    %109 = vector.load %arg9[%c0_85, %c18_86] : memref<8x324xf32, #tpu.memory_space<vmem>>, vector<8x286xf32>
    %c3_87 = arith.constant 3 : index
    %c0_88 = arith.constant 0 : index
    %c0_89 = arith.constant 0 : index
    %110 = vector.load %arg4[%c3_87, %c0_88, %c0_89] : memref<9x8x8xf32, #tpu.memory_space<vmem>>, vector<1x8x8xf32>
    %111 = vector.shape_cast %110 : vector<1x8x8xf32> to vector<8x8xf32>
    %cst_90 = arith.constant dense<0.000000e+00> : vector<8x286xf32>
    %112 = tpu.matmul %111, %109, %cst_90 {dimension_numbers = #tpu.dot_dimension_numbers<[1], [0], [0], [1], [0, 0, 1, 1], [], []>} : vector<8x8xf32>, vector<8x286xf32>, vector<8x286xf32> -> vector<8x286xf32>
    %113 = arith.addf %108, %112 : vector<8x286xf32>
    %c0_91 = arith.constant 0 : index
    %c19_92 = arith.constant 19 : index
    %114 = vector.load %arg9[%c0_91, %c19_92] : memref<8x324xf32, #tpu.memory_space<vmem>>, vector<8x286xf32>
    %c4_93 = arith.constant 4 : index
    %c0_94 = arith.constant 0 : index
    %c0_95 = arith.constant 0 : index
    %115 = vector.load %arg4[%c4_93, %c0_94, %c0_95] : memref<9x8x8xf32, #tpu.memory_space<vmem>>, vector<1x8x8xf32>
    %116 = vector.shape_cast %115 : vector<1x8x8xf32> to vector<8x8xf32>
    %cst_96 = arith.constant dense<0.000000e+00> : vector<8x286xf32>
    %117 = tpu.matmul %116, %114, %cst_96 {dimension_numbers = #tpu.dot_dimension_numbers<[1], [0], [0], [1], [0, 0, 1, 1], [], []>} : vector<8x8xf32>, vector<8x286xf32>, vector<8x286xf32> -> vector<8x286xf32>
    %118 = arith.addf %113, %117 : vector<8x286xf32>
    %c0_97 = arith.constant 0 : index
    %c20_98 = arith.constant 20 : index
    %119 = vector.load %arg9[%c0_97, %c20_98] : memref<8x324xf32, #tpu.memory_space<vmem>>, vector<8x286xf32>
    %c5_99 = arith.constant 5 : index
    %c0_100 = arith.constant 0 : index
    %c0_101 = arith.constant 0 : index
    %120 = vector.load %arg4[%c5_99, %c0_100, %c0_101] : memref<9x8x8xf32, #tpu.memory_space<vmem>>, vector<1x8x8xf32>
    %121 = vector.shape_cast %120 : vector<1x8x8xf32> to vector<8x8xf32>
    %cst_102 = arith.constant dense<0.000000e+00> : vector<8x286xf32>
    %122 = tpu.matmul %121, %119, %cst_102 {dimension_numbers = #tpu.dot_dimension_numbers<[1], [0], [0], [1], [0, 0, 1, 1], [], []>} : vector<8x8xf32>, vector<8x286xf32>, vector<8x286xf32> -> vector<8x286xf32>
    %123 = arith.addf %118, %122 : vector<8x286xf32>
    %c0_103 = arith.constant 0 : index
    %c36_104 = arith.constant 36 : index
    %124 = vector.load %arg9[%c0_103, %c36_104] : memref<8x324xf32, #tpu.memory_space<vmem>>, vector<8x286xf32>
    %c6_105 = arith.constant 6 : index
    %c0_106 = arith.constant 0 : index
    %c0_107 = arith.constant 0 : index
    %125 = vector.load %arg4[%c6_105, %c0_106, %c0_107] : memref<9x8x8xf32, #tpu.memory_space<vmem>>, vector<1x8x8xf32>
    %126 = vector.shape_cast %125 : vector<1x8x8xf32> to vector<8x8xf32>
    %cst_108 = arith.constant dense<0.000000e+00> : vector<8x286xf32>
    %127 = tpu.matmul %126, %124, %cst_108 {dimension_numbers = #tpu.dot_dimension_numbers<[1], [0], [0], [1], [0, 0, 1, 1], [], []>} : vector<8x8xf32>, vector<8x286xf32>, vector<8x286xf32> -> vector<8x286xf32>
    %128 = arith.addf %123, %127 : vector<8x286xf32>
    %c0_109 = arith.constant 0 : index
    %c37_110 = arith.constant 37 : index
    %129 = vector.load %arg9[%c0_109, %c37_110] : memref<8x324xf32, #tpu.memory_space<vmem>>, vector<8x286xf32>
    %c7_111 = arith.constant 7 : index
    %c0_112 = arith.constant 0 : index
    %c0_113 = arith.constant 0 : index
    %130 = vector.load %arg4[%c7_111, %c0_112, %c0_113] : memref<9x8x8xf32, #tpu.memory_space<vmem>>, vector<1x8x8xf32>
    %131 = vector.shape_cast %130 : vector<1x8x8xf32> to vector<8x8xf32>
    %cst_114 = arith.constant dense<0.000000e+00> : vector<8x286xf32>
    %132 = tpu.matmul %131, %129, %cst_114 {dimension_numbers = #tpu.dot_dimension_numbers<[1], [0], [0], [1], [0, 0, 1, 1], [], []>} : vector<8x8xf32>, vector<8x286xf32>, vector<8x286xf32> -> vector<8x286xf32>
    %133 = arith.addf %128, %132 : vector<8x286xf32>
    %c0_115 = arith.constant 0 : index
    %c38_116 = arith.constant 38 : index
    %134 = vector.load %arg9[%c0_115, %c38_116] : memref<8x324xf32, #tpu.memory_space<vmem>>, vector<8x286xf32>
    %c8_117 = arith.constant 8 : index
    %c0_118 = arith.constant 0 : index
    %c0_119 = arith.constant 0 : index
    %135 = vector.load %arg4[%c8_117, %c0_118, %c0_119] : memref<9x8x8xf32, #tpu.memory_space<vmem>>, vector<1x8x8xf32>
    %136 = vector.shape_cast %135 : vector<1x8x8xf32> to vector<8x8xf32>
    %cst_120 = arith.constant dense<0.000000e+00> : vector<8x286xf32>
    %137 = tpu.matmul %136, %134, %cst_120 {dimension_numbers = #tpu.dot_dimension_numbers<[1], [0], [0], [1], [0, 0, 1, 1], [], []>} : vector<8x8xf32>, vector<8x286xf32>, vector<8x286xf32> -> vector<8x286xf32>
    %138 = arith.addf %133, %137 : vector<8x286xf32>
    %c0_121 = arith.constant 0 : index
    %c0_122 = arith.constant 0 : index
    %139 = vector.load %arg5[%c0_121, %c0_122] : memref<8x1xf32, #tpu.memory_space<vmem>>, vector<8x1xf32>
    %140 = vector.broadcast %139 : vector<8x1xf32> to vector<8x286xf32>
    %141 = arith.addf %138, %140 : vector<8x286xf32>
    %cst_123 = arith.constant 0.000000e+00 : f32
    %142 = vector.broadcast %cst_123 : f32 to vector<8x286xf32>
    %143 = arith.maximumf %141, %142 : vector<8x286xf32>
    %144 = vector.broadcast %8 : vector<1x286xf32> to vector<8x286xf32>
    %145 = arith.mulf %143, %144 : vector<8x286xf32>
    %c0_124 = arith.constant 0 : index
    %c19_125 = arith.constant 19 : index
    %146 = vector.load %arg9[%c0_124, %c19_125] : memref<8x324xf32, #tpu.memory_space<vmem>>, vector<8x286xf32>
    tpu.vector_store %arg9[%c0_124, %c19_125], %145 {strides = array<i32>} : memref<8x324xf32, #tpu.memory_space<vmem>>, vector<8x286xf32>,
    %c0_126 = arith.constant 0 : index
    %c0_127 = arith.constant 0 : index
    %147 = vector.load %arg9[%c0_126, %c0_127] : memref<8x324xf32, #tpu.memory_space<vmem>>, vector<8x286xf32>
    %c0_128 = arith.constant 0 : index
    %c0_129 = arith.constant 0 : index
    %c0_130 = arith.constant 0 : index
    %148 = vector.load %arg6[%c0_128, %c0_129, %c0_130] : memref<9x8x8xf32, #tpu.memory_space<vmem>>, vector<1x8x8xf32>
    %149 = vector.shape_cast %148 : vector<1x8x8xf32> to vector<8x8xf32>
    %cst_131 = arith.constant dense<0.000000e+00> : vector<8x286xf32>
    %150 = tpu.matmul %149, %147, %cst_131 {dimension_numbers = #tpu.dot_dimension_numbers<[1], [0], [0], [1], [0, 0, 1, 1], [], []>} : vector<8x8xf32>, vector<8x286xf32>, vector<8x286xf32> -> vector<8x286xf32>
    %c0_132 = arith.constant 0 : index
    %c1_133 = arith.constant 1 : index
    %151 = vector.load %arg9[%c0_132, %c1_133] : memref<8x324xf32, #tpu.memory_space<vmem>>, vector<8x286xf32>
    %c1_134 = arith.constant 1 : index
    %c0_135 = arith.constant 0 : index
    %c0_136 = arith.constant 0 : index
    %152 = vector.load %arg6[%c1_134, %c0_135, %c0_136] : memref<9x8x8xf32, #tpu.memory_space<vmem>>, vector<1x8x8xf32>
    %153 = vector.shape_cast %152 : vector<1x8x8xf32> to vector<8x8xf32>
    %cst_137 = arith.constant dense<0.000000e+00> : vector<8x286xf32>
    %154 = tpu.matmul %153, %151, %cst_137 {dimension_numbers = #tpu.dot_dimension_numbers<[1], [0], [0], [1], [0, 0, 1, 1], [], []>} : vector<8x8xf32>, vector<8x286xf32>, vector<8x286xf32> -> vector<8x286xf32>
    %155 = arith.addf %150, %154 : vector<8x286xf32>
    %c0_138 = arith.constant 0 : index
    %c2_139 = arith.constant 2 : index
    %156 = vector.load %arg9[%c0_138, %c2_139] : memref<8x324xf32, #tpu.memory_space<vmem>>, vector<8x286xf32>
    %c2_140 = arith.constant 2 : index
    %c0_141 = arith.constant 0 : index
    %c0_142 = arith.constant 0 : index
    %157 = vector.load %arg6[%c2_140, %c0_141, %c0_142] : memref<9x8x8xf32, #tpu.memory_space<vmem>>, vector<1x8x8xf32>
    %158 = vector.shape_cast %157 : vector<1x8x8xf32> to vector<8x8xf32>
    %cst_143 = arith.constant dense<0.000000e+00> : vector<8x286xf32>
    %159 = tpu.matmul %158, %156, %cst_143 {dimension_numbers = #tpu.dot_dimension_numbers<[1], [0], [0], [1], [0, 0, 1, 1], [], []>} : vector<8x8xf32>, vector<8x286xf32>, vector<8x286xf32> -> vector<8x286xf32>
    %160 = arith.addf %155, %159 : vector<8x286xf32>
    %c0_144 = arith.constant 0 : index
    %c18_145 = arith.constant 18 : index
    %161 = vector.load %arg9[%c0_144, %c18_145] : memref<8x324xf32, #tpu.memory_space<vmem>>, vector<8x286xf32>
    %c3_146 = arith.constant 3 : index
    %c0_147 = arith.constant 0 : index
    %c0_148 = arith.constant 0 : index
    %162 = vector.load %arg6[%c3_146, %c0_147, %c0_148] : memref<9x8x8xf32, #tpu.memory_space<vmem>>, vector<1x8x8xf32>
    %163 = vector.shape_cast %162 : vector<1x8x8xf32> to vector<8x8xf32>
    %cst_149 = arith.constant dense<0.000000e+00> : vector<8x286xf32>
    %164 = tpu.matmul %163, %161, %cst_149 {dimension_numbers = #tpu.dot_dimension_numbers<[1], [0], [0], [1], [0, 0, 1, 1], [], []>} : vector<8x8xf32>, vector<8x286xf32>, vector<8x286xf32> -> vector<8x286xf32>
    %165 = arith.addf %160, %164 : vector<8x286xf32>
    %c0_150 = arith.constant 0 : index
    %c19_151 = arith.constant 19 : index
    %166 = vector.load %arg9[%c0_150, %c19_151] : memref<8x324xf32, #tpu.memory_space<vmem>>, vector<8x286xf32>
    %c4_152 = arith.constant 4 : index
    %c0_153 = arith.constant 0 : index
    %c0_154 = arith.constant 0 : index
    %167 = vector.load %arg6[%c4_152, %c0_153, %c0_154] : memref<9x8x8xf32, #tpu.memory_space<vmem>>, vector<1x8x8xf32>
    %168 = vector.shape_cast %167 : vector<1x8x8xf32> to vector<8x8xf32>
    %cst_155 = arith.constant dense<0.000000e+00> : vector<8x286xf32>
    %169 = tpu.matmul %168, %166, %cst_155 {dimension_numbers = #tpu.dot_dimension_numbers<[1], [0], [0], [1], [0, 0, 1, 1], [], []>} : vector<8x8xf32>, vector<8x286xf32>, vector<8x286xf32> -> vector<8x286xf32>
    %170 = arith.addf %165, %169 : vector<8x286xf32>
    %c0_156 = arith.constant 0 : index
    %c20_157 = arith.constant 20 : index
    %171 = vector.load %arg9[%c0_156, %c20_157] : memref<8x324xf32, #tpu.memory_space<vmem>>, vector<8x286xf32>
    %c5_158 = arith.constant 5 : index
    %c0_159 = arith.constant 0 : index
    %c0_160 = arith.constant 0 : index
    %172 = vector.load %arg6[%c5_158, %c0_159, %c0_160] : memref<9x8x8xf32, #tpu.memory_space<vmem>>, vector<1x8x8xf32>
    %173 = vector.shape_cast %172 : vector<1x8x8xf32> to vector<8x8xf32>
    %cst_161 = arith.constant dense<0.000000e+00> : vector<8x286xf32>
    %174 = tpu.matmul %173, %171, %cst_161 {dimension_numbers = #tpu.dot_dimension_numbers<[1], [0], [0], [1], [0, 0, 1, 1], [], []>} : vector<8x8xf32>, vector<8x286xf32>, vector<8x286xf32> -> vector<8x286xf32>
    %175 = arith.addf %170, %174 : vector<8x286xf32>
    %c0_162 = arith.constant 0 : index
    %c36_163 = arith.constant 36 : index
    %176 = vector.load %arg9[%c0_162, %c36_163] : memref<8x324xf32, #tpu.memory_space<vmem>>, vector<8x286xf32>
    %c6_164 = arith.constant 6 : index
    %c0_165 = arith.constant 0 : index
    %c0_166 = arith.constant 0 : index
    %177 = vector.load %arg6[%c6_164, %c0_165, %c0_166] : memref<9x8x8xf32, #tpu.memory_space<vmem>>, vector<1x8x8xf32>
    %178 = vector.shape_cast %177 : vector<1x8x8xf32> to vector<8x8xf32>
    %cst_167 = arith.constant dense<0.000000e+00> : vector<8x286xf32>
    %179 = tpu.matmul %178, %176, %cst_167 {dimension_numbers = #tpu.dot_dimension_numbers<[1], [0], [0], [1], [0, 0, 1, 1], [], []>} : vector<8x8xf32>, vector<8x286xf32>, vector<8x286xf32> -> vector<8x286xf32>
    %180 = arith.addf %175, %179 : vector<8x286xf32>
    %c0_168 = arith.constant 0 : index
    %c37_169 = arith.constant 37 : index
    %181 = vector.load %arg9[%c0_168, %c37_169] : memref<8x324xf32, #tpu.memory_space<vmem>>, vector<8x286xf32>
    %c7_170 = arith.constant 7 : index
    %c0_171 = arith.constant 0 : index
    %c0_172 = arith.constant 0 : index
    %182 = vector.load %arg6[%c7_170, %c0_171, %c0_172] : memref<9x8x8xf32, #tpu.memory_space<vmem>>, vector<1x8x8xf32>
    %183 = vector.shape_cast %182 : vector<1x8x8xf32> to vector<8x8xf32>
    %cst_173 = arith.constant dense<0.000000e+00> : vector<8x286xf32>
    %184 = tpu.matmul %183, %181, %cst_173 {dimension_numbers = #tpu.dot_dimension_numbers<[1], [0], [0], [1], [0, 0, 1, 1], [], []>} : vector<8x8xf32>, vector<8x286xf32>, vector<8x286xf32> -> vector<8x286xf32>
    %185 = arith.addf %180, %184 : vector<8x286xf32>
    %c0_174 = arith.constant 0 : index
    %c38_175 = arith.constant 38 : index
    %186 = vector.load %arg9[%c0_174, %c38_175] : memref<8x324xf32, #tpu.memory_space<vmem>>, vector<8x286xf32>
    %c8_176 = arith.constant 8 : index
    %c0_177 = arith.constant 0 : index
    %c0_178 = arith.constant 0 : index
    %187 = vector.load %arg6[%c8_176, %c0_177, %c0_178] : memref<9x8x8xf32, #tpu.memory_space<vmem>>, vector<1x8x8xf32>
    %188 = vector.shape_cast %187 : vector<1x8x8xf32> to vector<8x8xf32>
    %cst_179 = arith.constant dense<0.000000e+00> : vector<8x286xf32>
    %189 = tpu.matmul %188, %186, %cst_179 {dimension_numbers = #tpu.dot_dimension_numbers<[1], [0], [0], [1], [0, 0, 1, 1], [], []>} : vector<8x8xf32>, vector<8x286xf32>, vector<8x286xf32> -> vector<8x286xf32>
    %190 = arith.addf %185, %189 : vector<8x286xf32>
    %c0_180 = arith.constant 0 : index
    %c0_181 = arith.constant 0 : index
    %191 = vector.load %arg7[%c0_180, %c0_181] : memref<8x1xf32, #tpu.memory_space<vmem>>, vector<8x1xf32>
    %192 = vector.broadcast %191 : vector<8x1xf32> to vector<8x286xf32>
    %193 = arith.addf %190, %192 : vector<8x286xf32>
    %cst_182 = arith.constant 0.000000e+00 : f32
    %194 = vector.broadcast %cst_182 : f32 to vector<8x286xf32>
    %195 = arith.maximumf %193, %194 : vector<8x286xf32>
    %196 = vector.extract_strided_slice %195 {offsets = [0, 0], sizes = [8, 285], strides = [1, 1]} : vector<8x286xf32> to vector<8x285xf32>
    %197 = vector.extract_strided_slice %195 {offsets = [0, 1], sizes = [8, 285], strides = [1, 1]} : vector<8x286xf32> to vector<8x285xf32>
    %198 = arith.maximumf %196, %197 : vector<8x285xf32>
    %199 = vector.extract_strided_slice %198 {offsets = [0, 0], sizes = [8, 267], strides = [1, 1]} : vector<8x285xf32> to vector<8x267xf32>
    %200 = vector.extract_strided_slice %198 {offsets = [0, 18], sizes = [8, 267], strides = [1, 1]} : vector<8x285xf32> to vector<8x267xf32>
    %201 = arith.maximumf %199, %200 : vector<8x267xf32>
    %202 = tpu.iota {dimensions = array<i32: 1>} : vector<1x64xi32>
    %c8_i32 = arith.constant 8 : i32
    %203 = vector.broadcast %c8_i32 : i32 to vector<1x64xi32>
    %204 = arith.cmpi sge, %202, %203 : vector<1x64xi32>
    %205 = arith.extui %204 : vector<1x64xi1> to vector<1x64xi32>
    %c0_i32 = arith.constant 0 : i32
    %206 = vector.broadcast %c0_i32 : i32 to vector<1x64xi32>
    %207 = arith.addi %206, %205 : vector<1x64xi32>
    %c16_i32_183 = arith.constant 16 : i32
    %208 = vector.broadcast %c16_i32_183 : i32 to vector<1x64xi32>
    %209 = arith.cmpi sge, %202, %208 : vector<1x64xi32>
    %210 = arith.extui %209 : vector<1x64xi1> to vector<1x64xi32>
    %211 = arith.addi %207, %210 : vector<1x64xi32>
    %c24_i32 = arith.constant 24 : i32
    %212 = vector.broadcast %c24_i32 : i32 to vector<1x64xi32>
    %213 = arith.cmpi sge, %202, %212 : vector<1x64xi32>
    %214 = arith.extui %213 : vector<1x64xi1> to vector<1x64xi32>
    %215 = arith.addi %211, %214 : vector<1x64xi32>
    %c32_i32 = arith.constant 32 : i32
    %216 = vector.broadcast %c32_i32 : i32 to vector<1x64xi32>
    %217 = arith.cmpi sge, %202, %216 : vector<1x64xi32>
    %218 = arith.extui %217 : vector<1x64xi1> to vector<1x64xi32>
    %219 = arith.addi %215, %218 : vector<1x64xi32>
    %c40_i32 = arith.constant 40 : i32
    %220 = vector.broadcast %c40_i32 : i32 to vector<1x64xi32>
    %221 = arith.cmpi sge, %202, %220 : vector<1x64xi32>
    %222 = arith.extui %221 : vector<1x64xi1> to vector<1x64xi32>
    %223 = arith.addi %219, %222 : vector<1x64xi32>
    %c48_i32 = arith.constant 48 : i32
    %224 = vector.broadcast %c48_i32 : i32 to vector<1x64xi32>
    %225 = arith.cmpi sge, %202, %224 : vector<1x64xi32>
    %226 = arith.extui %225 : vector<1x64xi1> to vector<1x64xi32>
    %227 = arith.addi %223, %226 : vector<1x64xi32>
    %c56_i32 = arith.constant 56 : i32
    %228 = vector.broadcast %c56_i32 : i32 to vector<1x64xi32>
    %229 = arith.cmpi sge, %202, %228 : vector<1x64xi32>
    %230 = arith.extui %229 : vector<1x64xi1> to vector<1x64xi32>
    %231 = arith.addi %227, %230 : vector<1x64xi32>
    %c2_i32 = arith.constant 2 : i32
    %232 = vector.broadcast %c2_i32 : i32 to vector<1x64xi32>
    %233 = arith.muli %232, %202 : vector<1x64xi32>
    %c20_i32 = arith.constant 20 : i32
    %234 = vector.broadcast %c20_i32 : i32 to vector<1x64xi32>
    %235 = arith.muli %234, %231 : vector<1x64xi32>
    %236 = arith.addi %233, %235 : vector<1x64xi32>
    %237 = tpu.iota {dimensions = array<i32: 0>} : vector<267x64xi32>
    %238 = vector.broadcast %236 : vector<1x64xi32> to vector<267x64xi32>
    %239 = arith.cmpi eq, %237, %238 : vector<267x64xi32>
    %240 = arith.extui %239 : vector<267x64xi1> to vector<267x64xi32>
    %241 = arith.sitofp %240 : vector<267x64xi32> to vector<267x64xf32>
    %cst_184 = arith.constant dense<0.000000e+00> : vector<8x64xf32>
    %242 = tpu.matmul %201, %241, %cst_184 {dimension_numbers = #tpu.dot_dimension_numbers<[1], [0], [0], [1], [0, 0, 1, 1], [], []>} : vector<8x267xf32>, vector<267x64xf32>, vector<8x64xf32> -> vector<8x64xf32>
    %c0_185 = arith.constant 0 : index
    %c0_186 = arith.constant 0 : index
    %c0_187 = arith.constant 0 : index
    %243 = vector.load %arg8[%c0_185, %c0_186, %c0_187] : memref<1x8x64xf32, #tpu.memory_space<vmem>>, vector<1x8x64xf32>
    %244 = vector.shape_cast %243 : vector<1x8x64xf32> to vector<8x64xf32>
    %245 = vector.shape_cast %242 : vector<8x64xf32> to vector<1x8x64xf32>
    tpu.vector_store %arg8[%c0_185, %c0_186, %c0_187], %245 {strides = array<i32>} : memref<1x8x64xf32, #tpu.memory_space<vmem>>, vector<1x8x64xf32>,
    return
  }
  func.func @transform_0(%arg0: i32) -> (i32, i32, i32) {
    %c0_i32 = arith.constant 0 : i32
    %c0_i32_0 = arith.constant 0 : i32
    %c0_i32_1 = arith.constant 0 : i32
    return %arg0, %c0_i32, %c0_i32_0 : i32, i32, i32
  }
  func.func @transform_1(%arg0: i32) -> (i32, i32, i32) {
    %c0_i32 = arith.constant 0 : i32
    %c0_i32_0 = arith.constant 0 : i32
    %c0_i32_1 = arith.constant 0 : i32
    %c0_i32_2 = arith.constant 0 : i32
    return %c0_i32, %c0_i32_0, %c0_i32_1 : i32, i32, i32
  }
  func.func @transform_2(%arg0: i32) -> (i32, i32) {
    %c0_i32 = arith.constant 0 : i32
    %c0_i32_0 = arith.constant 0 : i32
    %c0_i32_1 = arith.constant 0 : i32
    return %c0_i32, %c0_i32_0 : i32, i32
  }
  func.func @transform_3(%arg0: i32) -> (i32, i32, i32) {
    %c0_i32 = arith.constant 0 : i32
    %c0_i32_0 = arith.constant 0 : i32
    %c0_i32_1 = arith.constant 0 : i32
    %c0_i32_2 = arith.constant 0 : i32
    return %c0_i32, %c0_i32_0, %c0_i32_1 : i32, i32, i32
  }
  func.func @transform_4(%arg0: i32) -> (i32, i32) {
    %c0_i32 = arith.constant 0 : i32
    %c0_i32_0 = arith.constant 0 : i32
    %c0_i32_1 = arith.constant 0 : i32
    return %c0_i32, %c0_i32_0 : i32, i32
  }
  func.func @transform_5(%arg0: i32) -> (i32, i32, i32) {
    %c0_i32 = arith.constant 0 : i32
    %c0_i32_0 = arith.constant 0 : i32
    %c0_i32_1 = arith.constant 0 : i32
    %c0_i32_2 = arith.constant 0 : i32
    return %c0_i32, %c0_i32_0, %c0_i32_1 : i32, i32, i32
  }
  func.func @transform_6(%arg0: i32) -> (i32, i32) {
    %c0_i32 = arith.constant 0 : i32
    %c0_i32_0 = arith.constant 0 : i32
    %c0_i32_1 = arith.constant 0 : i32
    return %c0_i32, %c0_i32_0 : i32, i32
  }
  func.func @transform_7(%arg0: i32) -> (i32, i32, i32) {
    %c0_i32 = arith.constant 0 : i32
    %c0_i32_0 = arith.constant 0 : i32
    %c0_i32_1 = arith.constant 0 : i32
    return %arg0, %c0_i32, %c0_i32_0 : i32, i32, i32
  }
}

</mosaic_0001>

<bundles_post_ra>
// kernel: tpu_custom_call.1
= control target key start
LH: loop header
LB: loop body
LE: loop exit
PB: predicated region body
PF: predicated region fallthrough
CT: control target
= control target key end

     0   :  { %12 = vsyncpa [#allocation4], 0  ;;  %s6768_s0 = inlined_call_operand.vmem [shape: f32[2,4,256], index: 0, kind: input, shape index: {}]   ;;  %s6769_s1 = inlined_call_operand.vmem [shape: f32[9,8,4], index: 1, kind: input, shape index: {}]   ;;  %s6770_s2 = inlined_call_operand.vmem [shape: f32[8,1], index: 2, kind: input, shape index: {}]   ;;  %s6771_s3 = inlined_call_operand.vmem [shape: f32[9,8,8], index: 3, kind: input, shape index: {}]   ;;  %s6772_s4 = inlined_call_operand.vmem [shape: f32[8,1], index: 4, kind: input, shape index: {}]   ;;  %s6773_s5 = inlined_call_operand.vmem [shape: f32[9,8,8], index: 5, kind: input, shape index: {}]   ;;  %s6774_s6 = inlined_call_operand.vmem [shape: f32[8,1], index: 6, kind: input, shape index: {}]   ;;  %s6775_s7 = inlined_call_operand.hbm [shape: f32[2,8,64], index: 7, kind: output, shape index: {}]  }
   0x1   :  { %14 = vsyncpa [#allocation4 + $0x1], 0  ;;  %s6024_s24 = smov 0   ;;  %s6026_s25 = smov 0  }
   0x2   :  { %s6028_s26 = smov 0   ;;  %s6030_s27 = smov 0  }
   0x3 LB: > { %s6045_s28 = sadd.s32 4294967295, %s5939_s27   ;;  %s5279_s29 = sadd.s32 4294967294, %s5939_s27   ;;  %s5939_s27 = sphi %s6030_s27, %s6784_s27   ;;  %s5935_s26 = sphi %s6028_s26, %s6783_s26   ;;  %s5931_s25 = sphi %s6026_s25, %s6782_s25   ;;  %s5927_s24 = sphi %s6024_s24, %s6781_s24  }
   0x4   : > { %s6049_s30 = sadd.s32 1, %s5939_s27   ;;  %s179_s8 = sadd.s32 1, %s5935_s26 }
   0x5   : > { %s176_s9 = ssub.s32 %s5939_s27, %s6049_s30  ;;  %p189_p0 = scmp.ne.s32.totalorder %s5935_s26, %s5931_s25 }
   0x6   : > { %p177_p1 = scmp.eq.s32.totalorder %s176_s9, 0  ;;  %p190_p2 = scmp.eq.s32.totalorder %s6045_s28, 1 }
   0x7   : > { %p195_p3 = scmp.ne.s32.totalorder %s5931_s25, %s5927_s24  ;;  %p196_p4 = scmp.eq.s32.totalorder %s5279_s29, 1 }
   0x8   : > { %s6060_s10 = scalar_select %p177_p1, %s5935_s26, %s179_s8  }
   0x9   : > { %p6062_p5 = por %p190_p2, %p189_p0  ;;  %p6066_p6 = por %p196_p4, %p195_p3 }
   0xa   : > { %p5282_p7 = scmp.ge.s32.totalorder %s5939_s27, 1  ;;  %p240_p8 = scmp.lt.s32.totalorder %s5939_s27, 3 }
   0xc   : > { %p241_p9 = pnand %p5282_p7, %p240_p8 }
   0xd   : > { %p272_p10 = scmp.lt.s32.totalorder (!%p241_p9), %s6045_s28, 1  ;;  %v5941_v0 = vmov (!%p241_p9), 0.0   ;;  %s5942_s18 = smov (!%p241_p9), 19   ;;  %vm279_vm0 = vcmask (!%p241_p9), 556032   ;;  %vm367_vm1 = vcmask (!%p241_p9), 281752   ;;  %vm399_vm2 = vcmask (!%p241_p9), 117760  }
   0xe   : > { %244 = sbr.rel (%p241_p9) target bundleno = 2098 (0x832), region = 48  ;;  %277 = vst [vmem:[#allocation2] sm:$0xff] (!%p241_p9), %v5941_v0  ;;  %278 = vst [vmem:[#allocation2 + $0x8] sm:$0xff] (!%p241_p9), %v5941_v0  ;;  %542 = vmatprep.mubr.f32.mxu1 (!%p241_p9), %v5941_v0  ;;  %1016 = vmatprep.mubr.f32.mxu0 (!%p241_p9), %v5941_v0  ;;  %s5943_s19 = smov (!%p241_p9), 31   ;;  %vm404_vm3 = vcmask (!%p241_p9), 265352   ;;  %vm410_vm4 = vcmask (!%p241_p9), 412952   ;;  %v281_v22 = vlaneseq (!%p241_p9) }
   0xf   : > { %s5944_s20 = smov (!%p241_p9), 33   ;;  %s5945_s21 = smov (!%p241_p9), 35   ;;  %280 = vst.msk [vmem:[#allocation2 + $0x10] sm:$0xff] (!%p241_p9), %vm279_vm0, %v5941_v0  ;;  %vm372_vm5 = vcmask (!%p241_p9), 429352   ;;  %vm415_vm6 = vcmask (!%p241_p9), 560552   ;;  %vm377_vm7 = vcmask (!%p241_p9), 576952  }
  0x10   : > { %s5946_s22 = smov (!%p241_p9), 21   ;;  %s5947_s23 = smov (!%p241_p9), 37   ;;  %vm420_vm8 = vcmask (!%p241_p9), 708152   ;;  %vm382_vm9 = vcmask (!%p241_p9), 724552   ;;  %vm425_vm10 = vcmask (!%p241_p9), 855752   ;;  %vm437_vm11 = vcmask (!%p241_p9), 101376  }
  0x11   : > { %s5948_s29 = smov (!%p241_p9), 23   ;;  %s5949_s8 = smov (!%p241_p9), 39   ;;  %vm387_vm12 = vcmask (!%p241_p9), 872152   ;;  %vm430_vm13 = vcmask (!%p241_p9), 1003352   ;;  %vm442_vm14 = vcmask (!%p241_p9), 248952   ;;  %vm435_vm15 = vcmask (!%p241_p9), 1044456  }
  0x12   : > { %s5950_s9 = smov (!%p241_p9), 25   ;;  %s5953_s15 = smov (!%p241_p9), 27   ;;  %vm392_vm0 = vcmask (!%p241_p9), 1019752   ;;  %v5966_v23 = vmov (!%p241_p9), 0   ;;  %v282_v24 = vand.u32 (!%p241_p9), 127, %v281_v22  ;;  %v1914_v25 = vld [vmem:[%s6770_s2] sm:$0xff] (!%p241_p9) }
  0x13   : > { %s5954_s16 = smov (!%p241_p9), 43   ;;  %5865 = vset.pattern.permute.xlu0 (!%p241_p9), %v5966_v23  ;;  %v5287_v53 = vld [vmem:[%s6769_s1 + $0x8] sm:$0xff] (!%p241_p9)  ;;  %v6181_v54 = vld [vmem:[%s6769_s1 + $0x18] sm:$0xff] (!%p241_p9)  ;;  %v452_v61 = vld [vmem:[%s6769_s1] sm:$0xff] (!%p241_p9) }
  0x14   : > { %v4916_v40 = vmul.u32 (!%p241_p9), 2, %v282_v24  ;;  %v5310_v62 = vld [vmem:[%s6769_s1 + $0x20] sm:$0xff] (!%p241_p9) }
  0x15   : > { %s273_s13 = scalar_select %p272_p10, %s6045_s28, 1 }
  0x17   : > { %s5465_s14 = sshll.u32 %s273_s13, 3  ;;  %s5951_s13 = smov 41  }
  0x18   : > { %s276_s17 = scalar_lea.vmem %s6768_s0, %s5465_s14  ;;  %s5952_s14 = smov 45  }
  0x19   : > { %v362_v1 = vld [vmem:[%s276_s17] sm:$0xff]  ;;  %s5955_s17 = smov 47  }
  0x1a   : > { %364 = vrot.lane.b32.xlu1 %v362_v1, %s5942_s18  ;;  %394 = vrot.lane.b32.xlu0 %v362_v1, %s5943_s19  ;;  %v406_v2 = vcombine.high %v362_v1, %v362_v1  ;;  %s5956_s19 = smov 29  }
  0x1e   : > { %401 = vrot.lane.b32.xlu0 %v362_v1, %s5944_s20  ;;  %407 = vrot.lane.b32.xlu1 %v406_v2, %s5945_s21  ;;  %s5957_s20 = smov 49   ;;  %s5958_s21 = smov 110  }
  0x22   : > { %369 = vrot.lane.b32.xlu0 %v362_v1, %s5946_s22  ;;  %412 = vrot.lane.b32.xlu1 %v406_v2, %s5947_s23  ;;  %s5959_s22 = smov 127   ;;  %s5960_s23 = smov 109  }
  0x26   : > { %374 = vrot.lane.b32.xlu0 %v362_v1, %s5948_s29  ;;  %417 = vrot.lane.b32.xlu1 %v406_v2, %s5949_s8  ;;  %s5961_s29 = smov 126   ;;  %s5962_s8 = smov 108  }
  0x2a   : > { %379 = vrot.lane.b32.xlu0 %v362_v1, %s5950_s9  ;;  %422 = vrot.lane.b32.xlu1 %v406_v2, %s5951_s13  ;;  %s5963_s9 = smov 92   ;;  %s6776_s13 = smov 91  }
  0x2e   : > { %432 = vrot.lane.b32.xlu0 %v406_v2, %s5952_s14  ;;  %384 = vrot.lane.b32.xlu1 %v362_v1, %s5953_s15  ;;  %s5965_s14 = smov 90   ;;  %s5970_s15 = smov 36  }
  0x32   : > { %427 = vrot.lane.b32.xlu0 %v406_v2, %s5954_s16  ;;  %439 = vrot.lane.b32.xlu1 %v406_v2, %s5955_s17  ;;  %s5967_s17 = smov 18   ;;  %s5971_s16 = smov 52  }
  0x36   : > { %389 = vrot.lane.b32.xlu0 %v362_v1, %s5956_s19  ;;  %444 = vrot.lane.b32.xlu1 %v406_v2, %s5957_s20  ;;  %s5968_s19 = smov 16   ;;  %s5969_s20 = smov 34  }
  0x8c   : > { %v365_v3 = vpop.permute.xlu1 %364  ;;  %v395_v4 = vpop.permute.xlu0 %394 }
  0x8d   : > { %368 = vst.msk [vmem:[#allocation2] sm:$0xf] %vm367_vm1, %v365_v3  ;;  %vm447_vm1 = vcmask 396552  }
  0x8e   : > { %400 = vst.msk [vmem:[#allocation2 + $0x8] sm:$0xf] %vm399_vm2, %v395_v4  ;;  %vm397_vm2 = vcmask 1044472  }
  0x90   : > { %v402_v5 = vpop.permute.xlu0 %401  ;;  %v408_v6 = vpop.permute.xlu1 %407 }
  0x91   : > { %405 = vst.msk [vmem:[#allocation2 + $0x8] sm:$0xf] %vm404_vm3, %v402_v5  ;;  %vm4896_vm3 = vcmp.ge.s32.totalorder %v282_v24, 8 }
  0x92   : > { %411 = vst.msk [vmem:[#allocation2 + $0x8] sm:$0xf] %vm410_vm4, %v408_v6  ;;  %vm4898_vm4 = vcmp.ge.s32.totalorder %v282_v24, 16  ;;  %v4897_v26 = vsel %vm4896_vm3, 1, %v5966_v23  ;;  %vm1431_vm3 = vcmask 752640  }
  0x93   : > { %v4899_v27 = vsel %vm4898_vm4, 1, %v5966_v23  ;;  %vm1595_vm4 = vcmask 744448  }
  0x94   : > { %v370_v7 = vpop.permute.xlu0 %369  ;;  %v413_v8 = vpop.permute.xlu1 %412  ;;  %v4900_v30 = vadd.s32 %v4899_v27, %v4897_v26  ;;  %v5328_v26 = vld [vmem:[%s6769_s1 + $0x38] sm:$0xff] }
  0x95   : > { %373 = vst.msk [vmem:[#allocation2] sm:$0xf] %vm372_vm5, %v370_v7  ;;  %vm4901_vm5 = vcmp.ge.s32.totalorder %v282_v24, 24  ;;  %v5298_v7 = vld [vmem:[%s6769_s1 + $0x10] sm:$0xff] }
  0x96   : > { %416 = vst.msk [vmem:[#allocation2 + $0x8] sm:$0xf] %vm415_vm6, %v413_v8  ;;  %vm4904_vm6 = vcmp.ge.s32.totalorder %v282_v24, 32  ;;  %v4902_v28 = vsel %vm4901_vm5, 1, %v5966_v23  ;;  %vm340_vm5 = vcmask 736256  }
  0x97   : > { %v4905_v29 = vsel %vm4904_vm6, 1, %v5966_v23  ;;  %v4903_v34 = vadd.s32 %v4902_v28, %v4900_v30  ;;  %vm332_vm6 = vcmask 146432  }
  0x98   : > { %v375_v9 = vpop.permute.xlu0 %374  ;;  %v418_v10 = vpop.permute.xlu1 %417 }
  0x99   : > { %378 = vst.msk [vmem:[#allocation2] sm:$0xf] %vm377_vm7, %v375_v9  ;;  %vm4907_vm7 = vcmp.ge.s32.totalorder %v282_v24, 40  ;;  %v4906_v36 = vadd.s32 %v4905_v29, %v4903_v34  ;;  %v5334_v29 = vld [vmem:[%s6769_s1 + $0x40] sm:$0xff] }
  0x9a   : > { %421 = vst.msk [vmem:[#allocation2 + $0x8] sm:$0xf] %vm420_vm8, %v418_v10  ;;  %vm4910_vm8 = vcmp.ge.s32.totalorder %v282_v24, 48  ;;  %v4908_v31 = vsel %vm4907_vm7, 1, %v5966_v23  ;;  %v5316_v10 = vld [vmem:[%s6769_s1 + $0x28] sm:$0xff]  ;;  %vm346_vm7 = vcmask 130048  }
  0x9b   : > { %v4911_v32 = vsel %vm4910_vm8, 1, %v5966_v23  ;;  %v4909_v37 = vadd.s32 %v4908_v31, %v4906_v36  ;;  %vm334_vm8 = vcmask 293888  }
  0x9c   : > { %v380_v11 = vpop.permute.xlu0 %379  ;;  %v423_v12 = vpop.permute.xlu1 %422 }
  0x9d   : > { %383 = vst.msk [vmem:[#allocation2] sm:$0xf] %vm382_vm9, %v380_v11  ;;  %vm4913_vm9 = vcmp.ge.s32.totalorder %v282_v24, 56  ;;  %v4912_v38 = vadd.s32 %v4911_v32, %v4909_v37 }
  0x9e   : > { %426 = vst.msk [vmem:[#allocation2 + $0x8] sm:$0xf] %vm425_vm10, %v423_v12  ;;  %v4914_v33 = vsel %vm4913_vm9, 1, %v5966_v23  ;;  %vm283_vm10 = vcmp.lt.s32.totalorder %v282_v24, 16  ;;  %vm348_vm9 = vcmask 277504  }
  0x9f   : > { %v6142_v35 = vsel %vm283_vm10, 1.0, %v5941_v0  ;;  %v4915_v39 = vadd.s32 %v4914_v33, %v4912_v38  ;;  %vm336_vm10 = vcmask 441344  }
  0xa0   : > { %v433_v13 = vpop.permute.xlu0 %432  ;;  %v385_v14 = vpop.permute.xlu1 %384 }
  0xa1   : > { %438 = vst.msk [vmem:[#allocation2 + $0x10] sm:$0xf] %vm437_vm11, %v433_v13  ;;  %v4917_v41 = vmul.u32 20, %v4915_v39  ;;  %vm464_vm11 = vcmask 1039360  }
  0xa2   : > { %388 = vst.msk [vmem:[#allocation2] sm:$0xf] %vm387_vm12, %v385_v14  ;;  %vm940_vm12 = vcmask 900096  }
  0xa3   : > { %v6151_v42 = vadd.s32 %v4917_v41, %v4916_v40 }
  0xa4   : > { %v428_v15 = vpop.permute.xlu0 %427  ;;  %v440_v16 = vpop.permute.xlu1 %439 }
  0xa5   : > { %431 = vst.msk [vmem:[#allocation2 + $0x8] sm:$0xf] %vm430_vm13, %v428_v15  ;;  %vm471_vm13 = vcmask 1043456  }
  0xa6   : > { %443 = vst.msk [vmem:[#allocation2 + $0x10] sm:$0xf] %vm442_vm14, %v440_v16  ;;  %vm467_vm14 = vcmask 31744  }
  0xa7   : > { %436 = vst.msk [vmem:[#allocation2 + $0x8] sm:$0xf] %vm435_vm15, %v433_v13  ;;  %vm5979_vm15 = vmmov 0  }
  0xa8   : > { %v390_v17 = vpop.permute.xlu0 %389  ;;  %v445_v18 = vpop.permute.xlu1 %444 }
  0xa9   : > { %393 = vst.msk [vmem:[#allocation2] sm:$0xf] %vm392_vm0, %v390_v17  ;;  %vm1104_vm0 = vcmask 891904  }
  0xaa   : > { %448 = vst.msk [vmem:[#allocation2 + $0x10] sm:$0xf] %vm447_vm1, %v445_v18  ;;  %vm344_vm1 = vcmask 1031168   ;;  %v5322_v18 = vld [vmem:[%s6769_s1 + $0x30] sm:$0xff] }
  0xab   : > { %398 = vst.msk [vmem:[#allocation2] sm:$0xf] %vm397_vm2, %v395_v4  ;;  %vm342_vm2 = vcmask 883712  }
  0xae   : > { %v6095_v21 = vld [vmem:[#allocation2 + $0x8] sm:$0xf] }
  0xb1   : > { %v6083_v19 = vld [vmem:[#allocation2 + $0x10] sm:$0xf] }
  0xb2   : > { %938 = vrot.lane.b32.xlu0 %v6083_v19, %s5958_s21  ;;  %462 = vrot.lane.b32.xlu1 %v6083_v19, %s5959_s22  ;;  %v6089_v20 = vld [vmem:[#allocation2] sm:$0xf] }
  0xb6   : > { %458 = vrot.lane.b32.xlu0 %v6089_v20, %s5959_s22  ;;  %934 = vrot.lane.b32.xlu1 %v6089_v20, %s5958_s21 }
  0xba   : > { %460 = vrot.lane.b32.xlu0 %v6095_v21, %s5959_s22  ;;  %936 = vrot.lane.b32.xlu1 %v6095_v21, %s5958_s21 }
  0xbe   : > { %1098 = vrot.lane.b32.xlu0 %v6089_v20, %s5960_s23  ;;  %1102 = vrot.lane.b32.xlu1 %v6083_v19, %s5960_s23 }
  0xc2   : > { %1100 = vrot.lane.b32.xlu0 %v6095_v21, %s5960_s23  ;;  %771 = vrot.lane.b32.xlu1 %v6089_v20, %s5961_s29 }
  0xc6   : > { %775 = vrot.lane.b32.xlu0 %v6083_v19, %s5961_s29  ;;  %773 = vrot.lane.b32.xlu1 %v6095_v21, %s5961_s29 }
  0xca   : > { %1264 = vrot.lane.b32.xlu0 %v6095_v21, %s5962_s8  ;;  %1266 = vrot.lane.b32.xlu1 %v6083_v19, %s5962_s8 }
  0xce   : > { %1262 = vrot.lane.b32.xlu0 %v6089_v20, %s5962_s8  ;;  %1427 = vrot.lane.b32.xlu1 %v6095_v21, %s5963_s9 }
  0xd2   : > { %1429 = vrot.lane.b32.xlu0 %v6083_v19, %s5963_s9  ;;  %1425 = vrot.lane.b32.xlu1 %v6089_v20, %s5963_s9 }
  0xd6   : > { %1591 = vrot.lane.b32.xlu0 %v6095_v21, %s6776_s13  ;;  %1593 = vrot.lane.b32.xlu1 %v6083_v19, %s6776_s13 }
  0xda   : > { %1589 = vrot.lane.b32.xlu0 %v6089_v20, %s6776_s13  ;;  %1755 = vrot.lane.b32.xlu1 %v6095_v21, %s5965_s14  ;;  %s5974_s13 = smov 72  }
  0xde   : > { %1757 = vrot.lane.b32.xlu0 %v6083_v19, %s5965_s14  ;;  %1753 = vrot.lane.b32.xlu1 %v6089_v20, %s5965_s14 }
  0xe2   : > { %1917 = vperm.xlu0 %5865, %v1914_v25   ;;  %287 = vrot.lane.b32.xlu1 %v6142_v35, %s5967_s17  ;;  %s5972_s17 = smov 54  }
  0xe6   : > { %308 = vrot.lane.b32.xlu0 %v6142_v35, %s5968_s19  ;;  %305 = vrot.lane.b32.xlu1 %v6142_v35, %s5961_s29  ;;  %s5973_s19 = smov 70  }
  0xea   : > { %311 = vrot.lane.b32.xlu0 %v6142_v35, %s5969_s20  ;;  %290 = vrot.lane.b32.xlu1 %v6142_v35, %s5970_s15  ;;  %s5975_s20 = smov 88   ;;  %s5976_s15 = smov 106  }
  0xee   : > { %314 = vrot.lane.b32.xlu0 %v6142_v35, %s5971_s16  ;;  %293 = vrot.lane.b32.xlu1 %v6142_v35, %s5972_s17  ;;  %s5977_s16 = smov 14   ;;  %s5978_s17 = smov 124  }
  0xf2   : > { %317 = vrot.lane.b32.xlu0 %v6142_v35, %s5973_s19  ;;  %296 = vrot.lane.b32.xlu1 %v6142_v35, %s5974_s13  ;;  %s6780_s13 = smov 91  }
  0xf6   : > { %320 = vrot.lane.b32.xlu0 %v6142_v35, %s5975_s20  ;;  %299 = vrot.lane.b32.xlu1 %v6142_v35, %s5965_s14  ;;  %s5462_s20 = sshll.u32 %s6045_s28, 7  ;;  %s5983_s28 = smov [#allocation3]  }
  0xfa   : > { %323 = vrot.lane.b32.xlu0 %v6142_v35, %s5976_s15  ;;  %302 = vrot.lane.b32.xlu1 %v6142_v35, %s5962_s8 }
  0xfe   : > { %329 = vrot.lane.b32.xlu0 %v6142_v35, %s5977_s16  ;;  %326 = vrot.lane.b32.xlu1 %v6142_v35, %s5978_s17 }
 0x124   : > { %v6164_v43 = vpop.permute.xlu0 %938  ;;  %v463_v44 = vpop.permute.xlu1 %462 }
 0x128   : > { %v459_v45 = vpop.permute.xlu0 %458  ;;  %v935_v46 = vpop.permute.xlu1 %934 }
 0x12c   : > { %v461_v47 = vpop.permute.xlu0 %460  ;;  %v937_v48 = vpop.permute.xlu1 %936 }
 0x12d   : > { %v466_v49 = vsel %vm464_vm11, %v461_v47, %v463_v44  ;;  %v942_v50 = vsel %vm940_vm12, %v937_v48, %v6164_v43  ;;  %v465_v51 = vsel %vm464_vm11, %v459_v45, %v461_v47  ;;  %v941_v52 = vsel %vm940_vm12, %v935_v46, %v937_v48 }
 0x12e   : > { %5288 = vmatprep.subr.msk.mxu1 %vm471_vm13, %v466_v49  ;;  %5305 = vmatprep.subr.msk.mxu0 %vm471_vm13, %v942_v50 }
 0x12f   : > { %5289 = vmatpush1.msk.msra.mxu1 %vm471_vm13, %v465_v51  ;;  %5306 = vmatpush1.msk.msra.mxu0 %vm471_vm13, %v941_v52 }
 0x130   : > { %v1099_v55 = vpop.permute.xlu0 %1098  ;;  %5290 = vmatmul.mubr.msk.f32.vlgmr.msra.gmra.mrb[0].mxu1 %vm467_vm14, %v5287_v53  ;;  %5558 = vmatprep.subr.mxu1 %v5941_v0  ;;  %v6185_v56 = vpop.permute.xlu1 %1102 }
 0x131   : > { %5559 = vmatpush3.msk.msra.mxu1 %vm471_vm13, %v463_v44  ;;  %5560 = vmatprep.mubr.msk.f32.mxu1 %vm5979_vm15, %v5941_v0 }
 0x132   : > { %5293 = vmatprep.subr.msk.mxu1 %vm471_vm13, %v6095_v21  ;;  %5307 = vmatmul.mubr.msk.f32.vlgmr.msra.gmra.mrb[0].mxu0 %vm467_vm14, %v6181_v54 }
 0x133   : > { %1180 = vmatprep.mubr.f32.mxu0 %v5941_v0 }
 0x134   : > { %v1101_v57 = vpop.permute.xlu0 %1100  ;;  %5561 = vmatmul.mubr.msk.f32.vlgmr.msra.gmra.mrb[2].mxu1 %vm467_vm14, %v5287_v53  ;;  %v772_v58 = vpop.permute.xlu1 %771 }
 0x135   : > { %v1105_v59 = vsel %vm1104_vm0, %v1099_v55, %v1101_v57  ;;  %v1106_v60 = vsel %vm1104_vm0, %v1101_v57, %v6185_v56  ;;  %5294 = vmatpush1.msk.msra.mxu1 %vm471_vm13, %v6089_v20  ;;  %692 = vmatprep.mubr.f32.mxu1 %v5941_v0 }
 0x136   : > { %5311 = vmatprep.subr.msk.mxu0 %vm471_vm13, %v1106_v60  ;;  %5563 = vmatprep.subr.mxu1 %v5941_v0 }
 0x137   : > { %5312 = vmatpush1.msk.msra.mxu0 %vm471_vm13, %v1105_v59 }
 0x138   : > { %v776_v63 = vpop.permute.xlu0 %775  ;;  %5295 = vmatmul.mubr.msk.f32.vlgmr.msra.gmra.mrb[0].mxu1 %vm467_vm14, %v452_v61  ;;  %v774_v1 = vpop.permute.xlu1 %773 }
 0x139   : > { %5564 = vmatpush3.msk.msra.mxu1 %vm471_vm13, %v6083_v19  ;;  %v778_v2 = vsel %vm344_vm1, %v774_v1, %v776_v63  ;;  %5565 = vmatprep.mubr.msk.f32.mxu1 %vm5979_vm15, %v5941_v0  ;;  %v777_v3 = vsel %vm344_vm1, %v772_v58, %v774_v1 }
 0x13a   : > { %5299 = vmatprep.subr.msk.mxu1 %vm471_vm13, %v778_v2  ;;  %5313 = vmatmul.mubr.msk.f32.vlgmr.msra.gmra.mrb[0].mxu0 %vm467_vm14, %v5310_v62 }
 0x13b   : > { %1343 = vmatprep.mubr.f32.mxu0 %v5941_v0 }
 0x13c   : > { %v1265_v4 = vpop.permute.xlu0 %1264  ;;  %5566 = vmatmul.mubr.msk.f32.vlgmr.msra.gmra.mrb[4].mxu1 %vm467_vm14, %v452_v61  ;;  %v1267_v5 = vpop.permute.xlu1 %1266 }
 0x13d   : > { %5300 = vmatpush1.msk.msra.mxu1 %vm471_vm13, %v777_v3  ;;  %v1269_v6 = vsel %vm342_vm2, %v1265_v4, %v1267_v5  ;;  %852 = vmatprep.mubr.f32.mxu1 %v5941_v0 }
 0x13e   : > { %5317 = vmatprep.subr.msk.mxu0 %vm471_vm13, %v1269_v6  ;;  %5568 = vmatprep.subr.mxu1 %v5941_v0 }
 0x140   : > { %v1263_v8 = vpop.permute.xlu0 %1262  ;;  %5301 = vmatmul.mubr.msk.f32.vlgmr.msra.gmra.mrb[0].mxu1 %vm467_vm14, %v5298_v7  ;;  %v1428_v9 = vpop.permute.xlu1 %1427 }
 0x141   : > { %v1268_v11 = vsel %vm342_vm2, %v1263_v8, %v1265_v4  ;;  %5569 = vmatpush3.msk.msra.mxu1 %vm471_vm13, %v776_v63  ;;  %5570 = vmatprep.mubr.msk.f32.mxu1 %vm5979_vm15, %v5941_v0 }
 0x142   : > { %5318 = vmatpush1.msk.msra.mxu0 %vm471_vm13, %v1268_v11  ;;  %5573 = vmatprep.subr.mxu1 %v5941_v0 }
 0x143   : > { %5319 = vmatmul.mubr.msk.f32.vlgmr.msra.gmra.mrb[0].mxu0 %vm467_vm14, %v5316_v10 }
 0x144   : > { %v1430_v12 = vpop.permute.xlu0 %1429  ;;  %5571 = vmatmul.mubr.msk.f32.vlgmr.msra.gmra.mrb[6].mxu1 %vm467_vm14, %v5298_v7  ;;  %v1426_v13 = vpop.permute.xlu1 %1425  ;;  %1507 = vmatprep.mubr.f32.mxu0 %v5941_v0 }
 0x145   : > { %v1433_v14 = vsel %vm1431_vm3, %v1428_v9, %v1430_v12  ;;  %5574 = vmatpush3.msk.msra.mxu1 %vm471_vm13, %v6164_v43  ;;  %v1432_v15 = vsel %vm1431_vm3, %v1426_v13, %v1428_v9  ;;  %5575 = vmatprep.mubr.msk.f32.mxu1 %vm5979_vm15, %v5941_v0  ;;  %v6313_v13 = vshrl.u32 %v281_v22, 7 }
 0x146   : > { %5323 = vmatprep.subr.msk.mxu0 %vm471_vm13, %v1433_v14  ;;  %5578 = vmatprep.subr.mxu1 %v5941_v0 }
 0x147   : > { %5324 = vmatpush1.msk.msra.mxu0 %vm471_vm13, %v1432_v15 }
 0x148   : > { %v1592_v16 = vpop.permute.xlu0 %1591  ;;  %5576 = vmatmul.mubr.msk.f32.vlgmr.msra.gmra.mrb[8].mxu1 %vm467_vm14, %v6181_v54  ;;  %v1594_v17 = vpop.permute.xlu1 %1593 }
 0x149   : > { %5579 = vmatpush3.msk.msra.mxu1 %vm471_vm13, %v6185_v56  ;;  %v1597_v19 = vsel %vm1595_vm4, %v1592_v16, %v1594_v17  ;;  %5580 = vmatprep.mubr.msk.f32.mxu1 %vm5979_vm15, %v5941_v0 }
 0x14a   : > { %5329 = vmatprep.subr.msk.mxu0 %vm471_vm13, %v1597_v19  ;;  %5583 = vmatprep.subr.mxu1 %v5941_v0 }
 0x14b   : > { %5325 = vmatmul.mubr.msk.f32.vlgmr.msra.gmra.mrb[0].mxu0 %vm467_vm14, %v5322_v18 }
 0x14c   : > { %v1590_v20 = vpop.permute.xlu0 %1589  ;;  %5581 = vmatmul.mubr.msk.f32.vlgmr.msra.gmra.mrb[10].mxu1 %vm467_vm14, %v5310_v62  ;;  %v1756_v21 = vpop.permute.xlu1 %1755  ;;  %1671 = vmatprep.mubr.f32.mxu0 %v5941_v0 }
 0x14d   : > { %v1596_v23 = vsel %vm1595_vm4, %v1590_v20, %v1592_v16  ;;  %5584 = vmatpush3.msk.msra.mxu1 %vm471_vm13, %v1267_v5  ;;  %5585 = vmatprep.mubr.msk.f32.mxu1 %vm5979_vm15, %v5941_v0 }
 0x14e   : > { %5330 = vmatpush1.msk.msra.mxu0 %vm471_vm13, %v1596_v23  ;;  %5588 = vmatprep.subr.mxu1 %v5941_v0 }
 0x150   : > { %v1758_v24 = vpop.permute.xlu0 %1757  ;;  %5586 = vmatmul.mubr.msk.f32.vlgmr.msra.gmra.mrb[12].mxu1 %vm467_vm14, %v5316_v10  ;;  %v1754_v25 = vpop.permute.xlu1 %1753 }
 0x151   : > { %v1760_v27 = vsel %vm340_vm5, %v1756_v21, %v1758_v24  ;;  %5589 = vmatpush3.msk.msra.mxu1 %vm471_vm13, %v1430_v12  ;;  %v1759_v28 = vsel %vm340_vm5, %v1754_v25, %v1756_v21  ;;  %5590 = vmatprep.mubr.msk.f32.mxu1 %vm5979_vm15, %v5941_v0 }
 0x152   : > { %5335 = vmatprep.subr.msk.mxu0 %vm471_vm13, %v1760_v27  ;;  %5593 = vmatprep.subr.mxu1 %v5941_v0 }
 0x153   : > { %5331 = vmatmul.mubr.msk.f32.vlgmr.msra.gmra.mrb[0].mxu0 %vm467_vm14, %v5328_v26 }
 0x154   : > { %5336 = vmatpush1.msk.msra.mxu0 %vm471_vm13, %v1759_v28  ;;  %5591 = vmatmul.mubr.msk.f32.vlgmr.msra.gmra.mrb[14].mxu1 %vm467_vm14, %v5322_v18  ;;  %v288_v30 = vpop.permute.xlu1 %287 }
 0x155   : > { %5594 = vmatpush3.msk.msra.mxu1 %vm471_vm13, %v1594_v17  ;;  %5595 = vmatprep.mubr.msk.f32.mxu1 %vm5979_vm15, %v5941_v0  ;;  %v333_v54 = vsel %vm332_vm6, %v6142_v35, %v288_v30  ;;  %vm352_vm6 = vcmask 572416  }
 0x156   : > { %5598 = vmatprep.subr.mxu1 %v5941_v0  ;;  %1834 = vmatprep.mubr.f32.mxu0 %v5941_v0 }
 0x158   : > { %5596 = vmatmul.mubr.msk.f32.vlgmr.msra.gmra.mrb[16].mxu1 %vm467_vm14, %v5328_v26  ;;  %v6307_v34 = vpop.permute.xlu1 %305 }
 0x159   : > { %5599 = vmatpush3.msk.msra.mxu1 %vm471_vm13, %v1758_v24  ;;  %5600 = vmatprep.mubr.msk.f32.mxu1 %vm5979_vm15, %v5941_v0  ;;  %vm350_vm13 = vcmask 424960   ;;  %v1928_v24 = vsub.s32 0, %v6313_v13 }
 0x15a   : > { %5603 = vmatprep.subr.mxu1 %v5941_v0 }
 0x15b   : > { %5337 = vmatmul.mubr.msk.f32.vlgmr.msra.gmra.mrb[0].mxu0 %vm467_vm14, %v5334_v29 }
 0x15c   : > { %5601 = vmatmul.mubr.msk.f32.vlgmr.msra.gmra.mrb[18].mxu1 %vm467_vm14, %v5334_v29  ;;  %2049 = vmatprep.mubr.f32.mxu0 %v5941_v0  ;;  %v291_v40 = vpop.permute.xlu1 %290  ;;  %vm338_vm14 = vcmask 588800  }
 0x15d   : > { %5605 = vmatprep.mubr.msk.f32.mxu1 %vm5979_vm15, %v5941_v0  ;;  %v335_v60 = vsel %vm334_vm8, %v333_v54, %v291_v40  ;;  %vm356_vm8 = vcmask 867328   ;;  %v3390_v54 = vld [vmem:[%s6772_s4] sm:$0xff] }
 0x160   : > { %v294_v45 = vpop.permute.xlu1 %293 }
 0x161   : > { %v6305_v31 = vpop.permute.xlu0 %1917  ;;  %v337_v1 = vsel %vm336_vm10, %v335_v60, %v294_v45  ;;  %vm360_vm10 = vcmask 113664  }
 0x164   : > { %v297_v53 = vpop.permute.xlu1 %296 }
 0x165   : > { %v309_v36 = vpop.permute.xlu0 %308  ;;  %v339_v5 = vsel %vm338_vm14, %v337_v1, %v297_v53  ;;  %vm1950_vm14 = vcmask 154624  }
 0x166   : > { %v347_v56 = vsel %vm346_vm7, %v6307_v34, %v309_v36  ;;  %vm354_vm7 = vcmask 719872  }
 0x168   : > { %v300_v62 = vpop.permute.xlu1 %299 }
 0x169   : > { %v312_v41 = vpop.permute.xlu0 %311  ;;  %v341_v11 = vsel %vm340_vm5, %v339_v5, %v300_v62 }
 0x16a   : > { %v349_v61 = vsel %vm348_vm9, %v347_v56, %v312_v41  ;;  %vm358_vm9 = vcmask 1014784  }
 0x16c   : > { %v303_v10 = vpop.permute.xlu1 %302 }
 0x16d   : > { %v315_v47 = vpop.permute.xlu0 %314  ;;  %v343_v18 = vsel %vm342_vm2, %v341_v11, %v303_v10 }
 0x16e   : > { %v351_v35 = vsel %vm350_vm13, %v349_v61, %v315_v47  ;;  %v345_v22 = vsel %vm344_vm1, %v343_v18, %v6307_v34  ;;  %vm1956_vm13 = vcmask 1047704   ;;  %v5354_v18 = vld [vmem:[%s6771_s3 + $0x28] sm:$0xff] }
 0x170   : > { %v327_v19 = vpop.permute.xlu1 %326 }
 0x171   : > { %v318_v55 = vpop.permute.xlu0 %317 }
 0x172   : > { %v353_v7 = vsel %vm352_vm6, %v351_v35, %v318_v55  ;;  %vm1959_vm6 = vcmask 400384   ;;  %v5345_v35 = vld [vmem:[%s6771_s3 + $0x10] sm:$0xff] }
 0x175   : > { %v321_v2 = vpop.permute.xlu0 %320 }
 0x176   : > { %v355_v14 = vsel %vm354_vm7, %v353_v7, %v321_v2  ;;  %vm1981_vm7 = vcmask 64512  }
 0x179   : > { %v324_v12 = vpop.permute.xlu0 %323 }
 0x17a   : > { %v357_v20 = vsel %vm356_vm8, %v355_v14, %v324_v12  ;;  %v5351_v12 = vld [vmem:[%s6771_s3 + $0x20] sm:$0xff] }
 0x17d   : > { %v330_v23 = vpop.permute.xlu0 %329 }
 0x207   : > { %v615_v32 = vpop.f32.mrb[2].mxu1 }
 0x208   : > { %v5562_v33 = vpop.f32.mrb[3].mxu1 }
 0x20f   : > { %v765_v37 = vpop.f32.mrb[4].mxu1 }
 0x210   : > { %v766_v38 = vadd.f32 %v765_v37, %v615_v32  ;;  %v5567_v39 = vpop.f32.mrb[5].mxu1  ;;  %v359_v32 = vsel %vm358_vm9, %v357_v20, %v327_v19 }
 0x211   : > { %v6322_v39 = vrot.slane %v345_v22, %v1928_v24  ;;  %v6324_v41 = vrot.slane %v359_v32, %v1928_v24 }
 0x213   : > { %v854_v43 = vpop.f32.mrb[0].mxu1 }
 0x214   : > { %v856_v44 = vpop.f32.mrb[1].mxu1 }
 0x217   : > { %v925_v46 = vpop.f32.mrb[6].mxu1 }
 0x218   : > { %v931_v48 = vadd.f32 %v925_v46, %v766_v38  ;;  %v5572_v49 = vpop.f32.mrb[7].mxu1  ;;  %v361_v38 = vsel %vm360_vm10, %v327_v19, %v330_v23 }
 0x219   : > { %v6326_v46 = vrot.slane %v361_v38, %v1928_v24 }
 0x21b   : > { %v1089_v50 = vpop.f32.mrb[8].mxu1 }
 0x21c   : > { %v1095_v51 = vadd.f32 %v1089_v50, %v931_v48  ;;  %v5577_v52 = vpop.f32.mrb[9].mxu1 }
 0x21f   : > { %v1253_v57 = vpop.f32.mrb[10].mxu1 }
 0x220   : > { %v1259_v58 = vadd.f32 %v1253_v57, %v1095_v51  ;;  %v5582_v59 = vpop.f32.mrb[11].mxu1  ;;  %v5340_v57 = vld [vmem:[%s6771_s3 + $0x8] sm:$0xff] }
 0x223   : > { %v1416_v63 = vpop.f32.mrb[12].mxu1 }
 0x224   : > { %v1422_v3 = vadd.f32 %v1416_v63, %v1259_v58  ;;  %v5587_v4 = vpop.f32.mrb[13].mxu1  ;;  %v1964_v63 = vld [vmem:[%s6771_s3] sm:$0xff] }
 0x227   : > { %v1580_v6 = vpop.f32.mrb[14].mxu1 }
 0x228   : > { %v1586_v8 = vadd.f32 %v1580_v6, %v1422_v3  ;;  %v5592_v9 = vpop.f32.mrb[15].mxu1 }
 0x22b   : > { %v1744_v15 = vpop.f32.mrb[16].mxu1 }
 0x22c   : > { %v1750_v16 = vadd.f32 %v1744_v15, %v1586_v8  ;;  %v5597_v17 = vpop.f32.mrb[17].mxu1  ;;  %v5348_v8 = vld [vmem:[%s6771_s3 + $0x18] sm:$0xff] }
 0x22e   : > { %v1836_v21 = vpop.f32.mrb[0].mxu0 }
 0x22f   : > { %v5736_v25 = vadd.f32 %v1836_v21, %v854_v43  ;;  %v1838_v26 = vpop.f32.mrb[1].mxu0  ;;  %v1907_v27 = vpop.f32.mrb[18].mxu1  ;;  %v5357_v21 = vld [vmem:[%s6771_s3 + $0x30] sm:$0xff] }
 0x230   : > { %v5737_v28 = vadd.f32 %v1838_v26, %v856_v44  ;;  %v1913_v29 = vadd.f32 %v1907_v27, %v1750_v16  ;;  %v5602_v30 = vpop.f32.mrb[19].mxu1 }
 0x231   : > { %v1920_v33 = vadd.f32 %v5736_v25, %v6305_v31 }
 0x232   : > { %v1921_v36 = vadd.f32 %v5737_v28, %v6305_v31  ;;  %v1922_v37 = vadd.f32 %v6305_v31, %v1913_v29  ;;  %v5360_v28 = vld [vmem:[%s6771_s3 + $0x38] sm:$0xff] }
 0x233   : > { %v1923_v40 = vmax.f32 %v1920_v33, 0.0 }
 0x234   : > { %v1924_v43 = vmax.f32 %v1921_v36, 0.0  ;;  %v1925_v45 = vmax.f32 %v1922_v37, 0.0  ;;  %v5363_v36 = vld [vmem:[%s6771_s3 + $0x40] sm:$0xff] }
 0x235   : > { %v1938_v34 = vmul.f32 %v6322_v39, %v1923_v40 }
 0x236   : > { %v1939_v44 = vmul.f32 %v6324_v41, %v1924_v43  ;;  %v1940_v31 = vmul.f32 %v6326_v46, %v1925_v45 }
 0x237   : > { %1944 = vrot.lane.b32.xlu1 %v1938_v34, %s5942_s18 }
 0x238   : > { %1946 = vrot.lane.b32.xlu0 %v1939_v44, %s5942_s18 }
 0x23b   : > { %1948 = vrot.lane.b32.xlu1 %v1940_v31, %s5942_s18 }
 0x2a9   : > { %v1945_v47 = vpop.permute.xlu1 %1944 }
 0x2aa   : > { %1957 = vst.msk [vmem:[#allocation2] sm:$0xff] %vm1956_vm13, %v1945_v47  ;;  %v1947_v48 = vpop.permute.xlu0 %1946 }
 0x2ab   : > { %v1951_v49 = vsel %vm1950_vm14, %v1945_v47, %v1947_v48 }
 0x2ac   : > { %1972 = vrot.lane.b32.xlu0 %v1951_v49, %s5959_s22 }
 0x2ad   : > { %v1949_v50 = vpop.permute.xlu1 %1948 }
 0x2ae   : > { %v1952_v51 = vsel %vm1950_vm14, %v1947_v48, %v1949_v50 }
 0x2af   : > { %1960 = vst.msk [vmem:[#allocation2 + $0x10] sm:$0xff] %vm1959_vm6, %v1952_v51 }
 0x2b1   : > { %v1961_v52 = vld [vmem:[#allocation2] sm:$0xff] }
 0x2b2   : > { %1970 = vrot.lane.b32.xlu0 %v1961_v52, %s5959_s22 }
 0x2b6   : > { %v1963_v53 = vld [vmem:[#allocation2 + $0x10] sm:$0xff] }
 0x2b7   : > { %1974 = vrot.lane.b32.xlu1 %v1963_v53, %s5959_s22  ;;  %2276 = vrot.lane.b32.xlu0 %v1963_v53, %s5961_s29 }
 0x2bb   : > { %2274 = vrot.lane.b32.xlu1 %v1951_v49, %s5961_s29  ;;  %2434 = vrot.lane.b32.xlu0 %v1951_v49, %s5958_s21 }
 0x2bf   : > { %2272 = vrot.lane.b32.xlu1 %v1961_v52, %s5961_s29  ;;  %2432 = vrot.lane.b32.xlu0 %v1961_v52, %s5958_s21 }
 0x2c3   : > { %2436 = vrot.lane.b32.xlu1 %v1963_v53, %s5958_s21  ;;  %2596 = vrot.lane.b32.xlu0 %v1963_v53, %s5960_s23 }
 0x2c7   : > { %2594 = vrot.lane.b32.xlu1 %v1951_v49, %s5960_s23  ;;  %2754 = vrot.lane.b32.xlu0 %v1951_v49, %s5962_s8 }
 0x2cb   : > { %2592 = vrot.lane.b32.xlu1 %v1961_v52, %s5960_s23  ;;  %2752 = vrot.lane.b32.xlu0 %v1961_v52, %s5962_s8 }
 0x2cf   : > { %2756 = vrot.lane.b32.xlu1 %v1963_v53, %s5962_s8  ;;  %2916 = vrot.lane.b32.xlu0 %v1963_v53, %s5963_s9 }
 0x2d3   : > { %2914 = vrot.lane.b32.xlu1 %v1951_v49, %s5963_s9  ;;  %3074 = vrot.lane.b32.xlu0 %v1951_v49, %s6780_s13 }
 0x2d7   : > { %2912 = vrot.lane.b32.xlu1 %v1961_v52, %s5963_s9  ;;  %3072 = vrot.lane.b32.xlu0 %v1961_v52, %s6780_s13 }
 0x2db   : > { %3076 = vrot.lane.b32.xlu1 %v1963_v53, %s6780_s13  ;;  %3236 = vrot.lane.b32.xlu0 %v1963_v53, %s5965_s14 }
 0x2df   : > { %3234 = vrot.lane.b32.xlu1 %v1951_v49, %s5965_s14  ;;  %3393 = vperm.xlu0 %5865, %v3390_v54  }
 0x2e3   : > { %3232 = vrot.lane.b32.xlu1 %v1961_v52, %s5965_s14 }
 0x31e   : > { %v1973_v55 = vpop.permute.xlu0 %1972 }
 0x324   : > { %v1971_v56 = vpop.permute.xlu0 %1970 }
 0x325   : > { %v1976_v61 = vsel %vm464_vm11, %v1971_v56, %v1973_v55 }
 0x329   : > { %v1975_v58 = vpop.permute.xlu1 %1974  ;;  %v2277_v59 = vpop.permute.xlu0 %2276 }
 0x32a   : > { %5604 = vmatpush3.msra.mxu1 %v1975_v58  ;;  %v1977_v60 = vsel %vm464_vm11, %v1973_v55, %v1975_v58 }
 0x32b   : > { %1985 = vmatprep.subr.mxu0 %v1977_v60  ;;  %5606 = vmatmul.mubr.msk.f32.vlgmr.msra.gmra.mrb[20].mxu1 %vm1981_vm7, %v5340_v57 }
 0x32c   : > { %5608 = vmatprep.subr.mxu1 %v5941_v0  ;;  %1986 = vmatpush1.msra.mxu0 %v1976_v61 }
 0x32d   : > { %5609 = vmatpush3.msra.mxu1 %v1963_v53  ;;  %5341 = vmatmul.mubr.msk.f32.vlgmr.msra.gmra.mrb[2].mxu0 %vm1981_vm7, %v5340_v57  ;;  %v2275_v62 = vpop.permute.xlu1 %2274  ;;  %v2435_v1 = vpop.permute.xlu0 %2434 }
 0x32e   : > { %2129 = vmatprep.subr.mxu0 %v1951_v49  ;;  %5610 = vmatprep.mubr.msk.f32.mxu1 %vm5979_vm15, %v5941_v0  ;;  %v2279_v2 = vsel %vm344_vm1, %v2275_v62, %v2277_v59 }
 0x32f   : > { %2130 = vmatpush1.msra.mxu0 %v1961_v52  ;;  %5613 = vmatprep.subr.mxu1 %v5941_v0 }
 0x330   : > { %5611 = vmatmul.mubr.msk.f32.vlgmr.msra.gmra.mrb[22].mxu1 %vm1981_vm7, %v1964_v63  ;;  %2286 = vmatprep.subr.mxu0 %v2279_v2 }
 0x331   : > { %5614 = vmatpush3.msra.mxu1 %v2277_v59  ;;  %v2273_v3 = vpop.permute.xlu1 %2272  ;;  %2193 = vmatprep.mubr.f32.mxu0 %v5941_v0  ;;  %v2433_v4 = vpop.permute.xlu0 %2432 }
 0x332   : > { %5615 = vmatprep.mubr.msk.f32.mxu1 %vm5979_vm15, %v5941_v0  ;;  %5618 = vmatprep.subr.mxu1 %v5941_v0  ;;  %v2278_v5 = vsel %vm344_vm1, %v2273_v3, %v2275_v62  ;;  %v2438_v14 = vsel %vm940_vm12, %v2433_v4, %v2435_v1 }
 0x334   : > { %5616 = vmatmul.mubr.msk.f32.vlgmr.msra.gmra.mrb[24].mxu1 %vm1981_vm7, %v5345_v35 }
 0x335   : > { %5343 = vmatmul.mubr.msk.f32.vlgmr.msra.gmra.mrb[2].mxu0 %vm1981_vm7, %v1964_v63  ;;  %v2437_v6 = vpop.permute.xlu1 %2436  ;;  %v2597_v7 = vpop.permute.xlu0 %2596  ;;  %5620 = vmatprep.mubr.msk.f32.mxu1 %vm5979_vm15, %v5941_v0 }
 0x336   : > { %2287 = vmatpush1.msra.mxu0 %v2278_v5  ;;  %5619 = vmatpush3.msra.mxu1 %v2437_v6  ;;  %v2439_v9 = vsel %vm940_vm12, %v2435_v1, %v2437_v6 }
 0x337   : > { %2446 = vmatprep.subr.mxu0 %v2439_v9  ;;  %5623 = vmatprep.subr.mxu1 %v5941_v0 }
 0x338   : > { %5621 = vmatmul.mubr.msk.f32.vlgmr.msra.gmra.mrb[26].mxu1 %vm1981_vm7, %v5348_v8  ;;  %2350 = vmatprep.mubr.f32.mxu0 %v5941_v0 }
 0x339   : > { %v2595_v10 = vpop.permute.xlu1 %2594  ;;  %5624 = vmatpush3.msra.mxu1 %v2597_v7  ;;  %v2755_v11 = vpop.permute.xlu0 %2754  ;;  %5625 = vmatprep.mubr.msk.f32.mxu1 %vm5979_vm15, %v5941_v0 }
 0x33a   : > { %5628 = vmatprep.subr.mxu1 %v5941_v0  ;;  %v2599_v17 = vsel %vm1104_vm0, %v2595_v10, %v2597_v7 }
 0x33c   : > { %5626 = vmatmul.mubr.msk.f32.vlgmr.msra.gmra.mrb[28].mxu1 %vm1981_vm7, %v5351_v12 }
 0x33d   : > { %5346 = vmatmul.mubr.msk.f32.vlgmr.msra.gmra.mrb[2].mxu0 %vm1981_vm7, %v5345_v35  ;;  %v2593_v15 = vpop.permute.xlu1 %2592  ;;  %v2753_v16 = vpop.permute.xlu0 %2752  ;;  %5630 = vmatprep.mubr.msk.f32.mxu1 %vm5979_vm15, %v5941_v0 }
 0x33e   : > { %2447 = vmatpush1.msra.mxu0 %v2438_v14  ;;  %2510 = vmatprep.mubr.f32.mxu0 %v5941_v0  ;;  %v2598_v23 = vsel %vm1104_vm0, %v2593_v15, %v2595_v10  ;;  %v2758_v29 = vsel %vm342_vm2, %v2753_v16, %v2755_v11 }
 0x33f   : > { %2606 = vmatprep.subr.mxu0 %v2599_v17 }
 0x341   : > { %v2757_v19 = vpop.permute.xlu1 %2756  ;;  %v2917_v20 = vpop.permute.xlu0 %2916 }
 0x342   : > { %5629 = vmatpush3.msra.mxu1 %v2757_v19  ;;  %v2759_v26 = vsel %vm342_vm2, %v2755_v11, %v2757_v19 }
 0x343   : > { %5633 = vmatprep.subr.mxu1 %v5941_v0  ;;  %5631 = vmatmul.mubr.msk.f32.vlgmr.msra.gmra.mrb[30].mxu1 %vm1981_vm7, %v5354_v18 }
 0x344   : > { %5634 = vmatpush3.msra.mxu1 %v2917_v20  ;;  %5635 = vmatprep.mubr.msk.f32.mxu1 %vm5979_vm15, %v5941_v0 }
 0x345   : > { %5349 = vmatmul.mubr.msk.f32.vlgmr.msra.gmra.mrb[2].mxu0 %vm1981_vm7, %v5348_v8  ;;  %v2915_v24 = vpop.permute.xlu1 %2914  ;;  %v3075_v25 = vpop.permute.xlu0 %3074  ;;  %5638 = vmatprep.subr.mxu1 %v5941_v0 }
 0x346   : > { %2607 = vmatpush1.msra.mxu0 %v2598_v23  ;;  %2670 = vmatprep.mubr.f32.mxu0 %v5941_v0  ;;  %v2919_v32 = vsel %vm1431_vm3, %v2915_v24, %v2917_v20 }
 0x347   : > { %2766 = vmatprep.subr.mxu0 %v2759_v26  ;;  %5636 = vmatmul.mubr.msk.f32.vlgmr.msra.gmra.mrb[32].mxu1 %vm1981_vm7, %v5357_v21  ;;  %v4850_v26 = vld [vmem:[%s6774_s6] sm:$0xff] }
 0x348   : > { %5640 = vmatprep.mubr.msk.f32.mxu1 %vm5979_vm15, %v5941_v0 }
 0x349   : > { %v2913_v27 = vpop.permute.xlu1 %2912  ;;  %v3073_v22 = vpop.permute.xlu0 %3072 }
 0x34a   : > { %v2918_v37 = vsel %vm1431_vm3, %v2913_v27, %v2915_v24  ;;  %v3078_v43 = vsel %vm1595_vm4, %v3073_v22, %v3075_v25 }
 0x34d   : > { %5352 = vmatmul.mubr.msk.f32.vlgmr.msra.gmra.mrb[2].mxu0 %vm1981_vm7, %v5351_v12  ;;  %v3077_v30 = vpop.permute.xlu1 %3076  ;;  %v3237_v33 = vpop.permute.xlu0 %3236 }
 0x34e   : > { %2767 = vmatpush1.msra.mxu0 %v2758_v29  ;;  %5639 = vmatpush3.msra.mxu1 %v3077_v30  ;;  %v3079_v38 = vsel %vm1595_vm4, %v3075_v25, %v3077_v30 }
 0x34f   : > { %2926 = vmatprep.subr.mxu0 %v2919_v32  ;;  %5641 = vmatmul.mubr.msk.f32.vlgmr.msra.gmra.mrb[34].mxu1 %vm1981_vm7, %v5360_v28 }
 0x350   : > { %5643 = vmatprep.subr.mxu1 %v5941_v0  ;;  %5645 = vmatprep.mubr.msk.f32.mxu1 %vm5979_vm15, %v5941_v0 }
 0x351   : > { %5644 = vmatpush3.msra.mxu1 %v3237_v33  ;;  %2830 = vmatprep.mubr.f32.mxu0 %v5941_v0  ;;  %v3235_v40 = vpop.permute.xlu1 %3234 }
 0x352   : > { %5648 = vmatprep.subr.mxu1 %v5941_v0  ;;  %v3239_v45 = vsel %vm340_vm5, %v3235_v40, %v3237_v33 }
 0x353   : > { %5646 = vmatmul.mubr.msk.f32.vlgmr.msra.gmra.mrb[36].mxu1 %vm1981_vm7, %v5363_v36 }
 0x354   : > { %5650 = vmatprep.mubr.msk.f32.mxu1 %vm5979_vm15, %v5941_v0 }
 0x355   : > { %5355 = vmatmul.mubr.msk.f32.vlgmr.msra.gmra.mrb[2].mxu0 %vm1981_vm7, %v5354_v18  ;;  %v3233_v34 = vpop.permute.xlu1 %3232 }
 0x356   : > { %2927 = vmatpush1.msra.mxu0 %v2918_v37  ;;  %2990 = vmatprep.mubr.f32.mxu0 %v5941_v0  ;;  %v3238_v44 = vsel %vm340_vm5, %v3233_v34, %v3235_v40  ;;  %v3425_v37 = vld [vmem:[%s6773_s5] sm:$0xff] }
 0x357   : > { %3086 = vmatprep.subr.mxu0 %v3079_v38 }
 0x35d   : > { %5358 = vmatmul.mubr.msk.f32.vlgmr.msra.gmra.mrb[2].mxu0 %vm1981_vm7, %v5357_v21 }
 0x35e   : > { %3087 = vmatpush1.msra.mxu0 %v3078_v43  ;;  %3150 = vmatprep.mubr.f32.mxu0 %v5941_v0  ;;  %v3394_v8 = vpop.permute.xlu0 %3393 }
 0x35f   : > { %3246 = vmatprep.subr.mxu0 %v3239_v45  ;;  %v5371_v45 = vld [vmem:[%s6773_s5 + $0x10] sm:$0xff] }
 0x365   : > { %5361 = vmatmul.mubr.msk.f32.vlgmr.msra.gmra.mrb[2].mxu0 %vm1981_vm7, %v5360_v28  ;;  %v5366_v28 = vld [vmem:[%s6773_s5 + $0x8] sm:$0xff] }
 0x366   : > { %3247 = vmatpush1.msra.mxu0 %v3238_v44  ;;  %3310 = vmatprep.mubr.f32.mxu0 %v5941_v0 }
 0x36d   : > { %5364 = vmatmul.mubr.msk.f32.vlgmr.msra.gmra.mrb[2].mxu0 %vm1981_vm7, %v5363_v36 }
 0x36e   : > { %3509 = vmatprep.mubr.f32.mxu0 %v5941_v0 }
 0x3fe   : > { %v2122_v31 = vpop.f32.mrb[20].mxu1 }
 0x3ff   : > { %v5607_v47 = vpop.f32.mrb[21].mxu1 }
 0x403   : > { %v2266_v48 = vpop.f32.mrb[22].mxu1 }
 0x404   : > { %v2267_v49 = vadd.f32 %v2266_v48, %v2122_v31  ;;  %v5612_v50 = vpop.f32.mrb[23].mxu1  ;;  %v5374_v48 = vld [vmem:[%s6773_s5 + $0x18] sm:$0xff] }
 0x407   : > { %v2423_v51 = vpop.f32.mrb[24].mxu1 }
 0x408   : > { %v2429_v52 = vadd.f32 %v2423_v51, %v2267_v49  ;;  %v5617_v53 = vpop.f32.mrb[25].mxu1 }
 0x40b   : > { %v2583_v54 = vpop.f32.mrb[26].mxu1 }
 0x40c   : > { %v2589_v55 = vadd.f32 %v2583_v54, %v2429_v52  ;;  %v5622_v56 = vpop.f32.mrb[27].mxu1  ;;  %v5377_v52 = vld [vmem:[%s6773_s5 + $0x20] sm:$0xff] }
 0x40f   : > { %v2743_v57 = vpop.f32.mrb[28].mxu1 }
 0x410   : > { %v2749_v58 = vadd.f32 %v2743_v57, %v2589_v55  ;;  %v5627_v59 = vpop.f32.mrb[29].mxu1  ;;  %v5380_v57 = vld [vmem:[%s6773_s5 + $0x28] sm:$0xff] }
 0x416   : > { %v2903_v60 = vpop.f32.mrb[30].mxu1 }
 0x417   : > { %v2909_v61 = vadd.f32 %v2903_v60, %v2749_v58  ;;  %v5632_v62 = vpop.f32.mrb[31].mxu1  ;;  %v5383_v60 = vld [vmem:[%s6773_s5 + $0x30] sm:$0xff] }
 0x41a   : > { %v3063_v63 = vpop.f32.mrb[32].mxu1 }
 0x41b   : > { %v3069_v1 = vadd.f32 %v3063_v63, %v2909_v61  ;;  %v5637_v2 = vpop.f32.mrb[33].mxu1 }
 0x422   : > { %v3223_v3 = vpop.f32.mrb[34].mxu1 }
 0x423   : > { %v3229_v4 = vadd.f32 %v3223_v3, %v3069_v1  ;;  %v5642_v35 = vpop.f32.mrb[35].mxu1 }
 0x426   : > { %v3383_v5 = vpop.f32.mrb[36].mxu1 }
 0x427   : > { %v3389_v6 = vadd.f32 %v3383_v5, %v3229_v4  ;;  %v5647_v7 = vpop.f32.mrb[37].mxu1  ;;  %v5386_v4 = vld [vmem:[%s6773_s5 + $0x38] sm:$0xff] }
 0x429   : > { %v3398_v10 = vadd.f32 %v3394_v8, %v3389_v6 }
 0x42b   : > { %v3401_v17 = vmax.f32 %v3398_v10, 0.0 }
 0x42d   : > { %v3404_v20 = vmul.f32 %v3401_v17, %v6326_v46 }
 0x440   : > { %v3312_v9 = vpop.f32.mrb[2].mxu0 }
 0x441   : > { %v3396_v11 = vadd.f32 %v3394_v8, %v3312_v9  ;;  %v3314_v12 = vpop.f32.mrb[3].mxu0 }
 0x442   : > { %v3397_v14 = vadd.f32 %v3394_v8, %v3314_v12  ;;  %v5389_v8 = vld [vmem:[%s6773_s5 + $0x40] sm:$0xff] }
 0x443   : > { %v3399_v15 = vmax.f32 %v3396_v11, 0.0 }
 0x444   : > { %v3400_v16 = vmax.f32 %v3397_v14, 0.0 }
 0x445   : > { %v3402_v18 = vmul.f32 %v3399_v15, %v6322_v39 }
 0x446   : > { %v3403_v19 = vmul.f32 %v3400_v16, %v6324_v41 }
 0x447   : > { %3408 = vrot.lane.b32.xlu1 %v3402_v18, %s5942_s18 }
 0x448   : > { %3410 = vrot.lane.b32.xlu0 %v3403_v19, %s5942_s18 }
 0x44b   : > { %3412 = vrot.lane.b32.xlu1 %v3404_v20, %s5942_s18 }
 0x4b9   : > { %v3409_v21 = vpop.permute.xlu1 %3408 }
 0x4ba   : > { %3419 = vst.msk [vmem:[#allocation2] sm:$0xff] %vm1956_vm13, %v3409_v21  ;;  %v3411_v23 = vpop.permute.xlu0 %3410 }
 0x4bb   : > { %v3414_v24 = vsel %vm1950_vm14, %v3409_v21, %v3411_v23 }
 0x4bc   : > { %3420 = vst [vmem:[#allocation2 + $0x8] sm:$0xff] %v3414_v24  ;;  %3433 = vrot.lane.b32.xlu0 %v3414_v24, %s5959_s22 }
 0x4bd   : > { %v3413_v39 = vpop.permute.xlu1 %3412 }
 0x4be   : > { %v3415_v41 = vsel %vm1950_vm14, %v3411_v23, %v3413_v39 }
 0x4bf   : > { %3421 = vst.msk [vmem:[#allocation2 + $0x10] sm:$0xff] %vm1959_vm6, %v3415_v41 }
 0x4c1   : > { %v3422_v25 = vld [vmem:[#allocation2] sm:$0xff] }
 0x4c2   : > { %3431 = vrot.lane.b32.xlu0 %v3422_v25, %s5959_s22 }
 0x4c6   : > { %v3424_v46 = vld [vmem:[#allocation2 + $0x10] sm:$0xff] }
 0x4c7   : > { %3435 = vrot.lane.b32.xlu1 %v3424_v46, %s5959_s22  ;;  %3736 = vrot.lane.b32.xlu0 %v3424_v46, %s5961_s29 }
 0x4cb   : > { %3734 = vrot.lane.b32.xlu1 %v3414_v24, %s5961_s29  ;;  %3894 = vrot.lane.b32.xlu0 %v3414_v24, %s5958_s21 }
 0x4cf   : > { %3732 = vrot.lane.b32.xlu1 %v3422_v25, %s5961_s29  ;;  %3892 = vrot.lane.b32.xlu0 %v3422_v25, %s5958_s21 }
 0x4d3   : > { %3896 = vrot.lane.b32.xlu1 %v3424_v46, %s5958_s21  ;;  %4056 = vrot.lane.b32.xlu0 %v3424_v46, %s5960_s23 }
 0x4d7   : > { %4054 = vrot.lane.b32.xlu1 %v3414_v24, %s5960_s23  ;;  %4214 = vrot.lane.b32.xlu0 %v3414_v24, %s5962_s8 }
 0x4db   : > { %4052 = vrot.lane.b32.xlu1 %v3422_v25, %s5960_s23  ;;  %4212 = vrot.lane.b32.xlu0 %v3422_v25, %s5962_s8  ;;  %s6726_s23 = scalar_lea.hbm %s6775_s7, %s5462_s20 }
 0x4df   : > { %4216 = vrot.lane.b32.xlu1 %v3424_v46, %s5962_s8  ;;  %4376 = vrot.lane.b32.xlu0 %v3424_v46, %s5963_s9 }
 0x4e3   : > { %4374 = vrot.lane.b32.xlu1 %v3414_v24, %s5963_s9  ;;  %4534 = vrot.lane.b32.xlu0 %v3414_v24, %s6780_s13 }
 0x4e7   : > { %4372 = vrot.lane.b32.xlu1 %v3422_v25, %s5963_s9  ;;  %4532 = vrot.lane.b32.xlu0 %v3422_v25, %s6780_s13  ;;  %s5881_s9 = sshll.u32 %s5983_s28, 4  ;;  %s5882_s9 = int_to_ptr.vmem [resolvable:$false] %s5881_s9 }
 0x4eb   : > { %4536 = vrot.lane.b32.xlu1 %v3424_v46, %s6780_s13  ;;  %4696 = vrot.lane.b32.xlu0 %v3424_v46, %s5965_s14 }
 0x4ef   : > { %4694 = vrot.lane.b32.xlu1 %v3414_v24, %s5965_s14  ;;  %4853 = vperm.xlu0 %5865, %v4850_v26  }
 0x4f3   : > { %4692 = vrot.lane.b32.xlu1 %v3422_v25, %s5965_s14  ;;  %s5883_s14 = scalar_lea.vmem %s5882_s9, 256 }
 0x52e   : > { %v3434_v27 = vpop.permute.xlu0 %3433 }
 0x534   : > { %v3432_v22 = vpop.permute.xlu0 %3431 }
 0x535   : > { %v3437_v33 = vsel %vm464_vm11, %v3432_v22, %v3434_v27 }
 0x539   : > { %v3436_v29 = vpop.permute.xlu1 %3435  ;;  %v3737_v30 = vpop.permute.xlu0 %3736 }
 0x53a   : > { %5649 = vmatpush3.msra.mxu1 %v3436_v29  ;;  %v3438_v32 = vsel %vm464_vm11, %v3434_v27, %v3436_v29 }
 0x53b   : > { %3445 = vmatprep.subr.mxu0 %v3438_v32  ;;  %5651 = vmatmul.mubr.msk.f32.vlgmr.msra.gmra.mrb[38].mxu1 %vm1981_vm7, %v5366_v28 }
 0x53c   : > { %5653 = vmatprep.subr.mxu1 %v5941_v0  ;;  %3446 = vmatpush1.msra.mxu0 %v3437_v33 }
 0x53d   : > { %5654 = vmatpush3.msra.mxu1 %v3424_v46  ;;  %v3735_v36 = vpop.permute.xlu1 %3734  ;;  %5367 = vmatmul.mubr.msk.f32.vlgmr.msra.gmra.mrb[4].mxu0 %vm1981_vm7, %v5366_v28  ;;  %v3895_v38 = vpop.permute.xlu0 %3894 }
 0x53e   : > { %3589 = vmatprep.subr.mxu0 %v3414_v24  ;;  %5655 = vmatprep.mubr.msk.f32.mxu1 %vm5979_vm15, %v5941_v0  ;;  %v3739_v40 = vsel %vm344_vm1, %v3735_v36, %v3737_v30 }
 0x53f   : > { %3590 = vmatpush1.msra.mxu0 %v3422_v25  ;;  %5658 = vmatprep.subr.mxu1 %v5941_v0 }
 0x540   : > { %5656 = vmatmul.mubr.msk.f32.vlgmr.msra.gmra.mrb[40].mxu1 %vm1981_vm7, %v3425_v37  ;;  %3746 = vmatprep.subr.mxu0 %v3739_v40 }
 0x541   : > { %5659 = vmatpush3.msra.mxu1 %v3737_v30  ;;  %v3733_v43 = vpop.permute.xlu1 %3732  ;;  %3653 = vmatprep.mubr.f32.mxu0 %v5941_v0  ;;  %v3893_v34 = vpop.permute.xlu0 %3892 }
 0x542   : > { %5660 = vmatprep.mubr.msk.f32.mxu1 %vm5979_vm15, %v5941_v0  ;;  %5663 = vmatprep.subr.mxu1 %v5941_v0  ;;  %v3738_v44 = vsel %vm344_vm1, %v3733_v43, %v3735_v36  ;;  %v3898_v53 = vsel %vm940_vm12, %v3893_v34, %v3895_v38 }
 0x544   : > { %5661 = vmatmul.mubr.msk.f32.vlgmr.msra.gmra.mrb[42].mxu1 %vm1981_vm7, %v5371_v45 }
 0x545   : > { %v3897_v31 = vpop.permute.xlu1 %3896  ;;  %5369 = vmatmul.mubr.msk.f32.vlgmr.msra.gmra.mrb[4].mxu0 %vm1981_vm7, %v3425_v37  ;;  %5665 = vmatprep.mubr.msk.f32.mxu1 %vm5979_vm15, %v5941_v0  ;;  %v4057_v47 = vpop.permute.xlu0 %4056 }
 0x546   : > { %3747 = vmatpush1.msra.mxu0 %v3738_v44  ;;  %5664 = vmatpush3.msra.mxu1 %v3897_v31  ;;  %v3899_v49 = vsel %vm940_vm12, %v3895_v38, %v3897_v31 }
 0x547   : > { %3906 = vmatprep.subr.mxu0 %v3899_v49  ;;  %5668 = vmatprep.subr.mxu1 %v5941_v0 }
 0x548   : > { %5666 = vmatmul.mubr.msk.f32.vlgmr.msra.gmra.mrb[44].mxu1 %vm1981_vm7, %v5374_v48  ;;  %3810 = vmatprep.mubr.f32.mxu0 %v5941_v0 }
 0x549   : > { %v4055_v50 = vpop.permute.xlu1 %4054  ;;  %5669 = vmatpush3.msra.mxu1 %v4057_v47  ;;  %v4215_v51 = vpop.permute.xlu0 %4214  ;;  %5670 = vmatprep.mubr.msk.f32.mxu1 %vm5979_vm15, %v5941_v0 }
 0x54a   : > { %5673 = vmatprep.subr.mxu1 %v5941_v0  ;;  %v4059_v56 = vsel %vm1104_vm0, %v4055_v50, %v4057_v47 }
 0x54c   : > { %5671 = vmatmul.mubr.msk.f32.vlgmr.msra.gmra.mrb[46].mxu1 %vm1981_vm7, %v5377_v52 }
 0x54d   : > { %v4053_v54 = vpop.permute.xlu1 %4052  ;;  %5372 = vmatmul.mubr.msk.f32.vlgmr.msra.gmra.mrb[4].mxu0 %vm1981_vm7, %v5371_v45  ;;  %v4213_v55 = vpop.permute.xlu0 %4212  ;;  %5675 = vmatprep.mubr.msk.f32.mxu1 %vm5979_vm15, %v5941_v0 }
 0x54e   : > { %3907 = vmatpush1.msra.mxu0 %v3898_v53  ;;  %3970 = vmatprep.mubr.f32.mxu0 %v5941_v0  ;;  %v4058_v61 = vsel %vm1104_vm0, %v4053_v54, %v4055_v50  ;;  %v4218_v35 = vsel %vm342_vm2, %v4213_v55, %v4215_v51  ;;  %v4953_v53 = vadd.s32 264, %v6313_v13  ;;  %v5980_v55 = vmov 0.0|0.0  }
 0x54f   : > { %4066 = vmatprep.subr.mxu0 %v4059_v56 }
 0x550   : > { %vm4987_vm1 = vcmp.eq.s32.totalorder %v4953_v53, %v6151_v42 }
 0x551   : > { %v4217_v58 = vpop.permute.xlu1 %4216  ;;  %v4377_v59 = vpop.permute.xlu0 %4376 }
 0x552   : > { %5674 = vmatpush3.msra.mxu1 %v4217_v58  ;;  %v4219_v1 = vsel %vm342_vm2, %v4215_v51, %v4217_v58 }
 0x553   : > { %5678 = vmatprep.subr.mxu1 %v5941_v0  ;;  %5676 = vmatmul.mubr.msk.f32.vlgmr.msra.gmra.mrb[48].mxu1 %vm1981_vm7, %v5380_v57 }
 0x554   : > { %5679 = vmatpush3.msra.mxu1 %v4377_v59  ;;  %5680 = vmatprep.mubr.msk.f32.mxu1 %vm5979_vm15, %v5941_v0 }
 0x555   : > { %v4375_v62 = vpop.permute.xlu1 %4374  ;;  %5375 = vmatmul.mubr.msk.f32.vlgmr.msra.gmra.mrb[4].mxu0 %vm1981_vm7, %v5374_v48  ;;  %v4535_v63 = vpop.permute.xlu0 %4534  ;;  %5683 = vmatprep.subr.mxu1 %v5941_v0 }
 0x556   : > { %4067 = vmatpush1.msra.mxu0 %v4058_v61  ;;  %4130 = vmatprep.mubr.f32.mxu0 %v5941_v0  ;;  %v4379_v6 = vsel %vm1431_vm3, %v4375_v62, %v4377_v59  ;;  %v5981_v59 = vmov 1.0   ;;  %v4936_v61 = vadd.s32 128, %v6313_v13 }
 0x557   : > { %4226 = vmatprep.subr.mxu0 %v4219_v1  ;;  %5681 = vmatmul.mubr.msk.f32.vlgmr.msra.gmra.mrb[50].mxu1 %vm1981_vm7, %v5383_v60  ;;  %v4939_v1 = vadd.s32 152, %v6313_v13 }
 0x558   : > { %5685 = vmatprep.mubr.msk.f32.mxu1 %vm5979_vm15, %v5941_v0 }
 0x559   : > { %v4373_v2 = vpop.permute.xlu1 %4372  ;;  %v4533_v3 = vpop.permute.xlu0 %4532  ;;  %vm4973_vm13 = vcmp.eq.s32.totalorder %v4939_v1, %v6151_v42 }
 0x55a   : > { %v4378_v9 = vsel %vm1431_vm3, %v4373_v2, %v4375_v62  ;;  %v4538_v12 = vsel %vm1595_vm4, %v4533_v3, %v4535_v63  ;;  %v4937_v62 = vadd.s32 136, %v6313_v13  ;;  %vm4954_vm3 = vcmp.eq.s32.totalorder %v6313_v13, %v6151_v42 }
 0x55b   : > { %v4922_v2 = vadd.s32 16, %v6313_v13  ;;  %v4923_v3 = vadd.s32 24, %v6313_v13 }
 0x55d   : > { %v4537_v5 = vpop.permute.xlu1 %4536  ;;  %5378 = vmatmul.mubr.msk.f32.vlgmr.msra.gmra.mrb[4].mxu0 %vm1981_vm7, %v5377_v52  ;;  %v4697_v7 = vpop.permute.xlu0 %4696  ;;  %v4952_v52 = vadd.s32 256, %v6313_v13  ;;  %vm4956_vm14 = vcmp.eq.s32.totalorder %v4922_v2, %v6151_v42 }
 0x55e   : > { %4227 = vmatpush1.msra.mxu0 %v4218_v35  ;;  %5684 = vmatpush3.msra.mxu1 %v4537_v5  ;;  %v4539_v10 = vsel %vm1595_vm4, %v4535_v63, %v4537_v5  ;;  %v4921_v63 = vadd.s32 8, %v6313_v13  ;;  %vm4970_vm4 = vcmp.eq.s32.totalorder %v4936_v61, %v6151_v42  ;;  %v5982_v35 = vmov 1.0|1.0  }
 0x55f   : > { %4386 = vmatprep.subr.mxu0 %v4379_v6  ;;  %5686 = vmatmul.mubr.msk.f32.vlgmr.msra.gmra.mrb[52].mxu1 %vm1981_vm7, %v5386_v4  ;;  %vm4986_vm0 = vcmp.eq.s32.totalorder %v4952_v52, %v6151_v42  ;;  %v4941_v5 = vadd.s32 168, %v6313_v13  ;;  %v4924_v6 = vadd.s32 32, %v6313_v13 }
 0x560   : > { %5688 = vmatprep.subr.mxu1 %v5941_v0  ;;  %5690 = vmatprep.mubr.msk.f32.mxu1 %vm5979_vm15, %v5941_v0  ;;  %vm4955_vm8 = vcmp.eq.s32.totalorder %v4921_v63, %v6151_v42 }
 0x561   : > { %5689 = vmatpush3.msra.mxu1 %v4697_v7  ;;  %4290 = vmatprep.mubr.f32.mxu0 %v5941_v0  ;;  %v4695_v11 = vpop.permute.xlu1 %4694  ;;  %vm5702_vm6 = vmpackc.low %vm4955_vm8, %vm4954_vm3 }
 0x562   : > { %v4699_v14 = vsel %vm340_vm5, %v4695_v11, %v4697_v7  ;;  %5732 = vmatprep.subr.bf16.mxu1 %v5980_v55  ;;  %v4925_v7 = vadd.s32 40, %v6313_v13 }
 0x563   : > { %5691 = vmatmul.mubr.msk.f32.vlgmr.msra.gmra.mrb[54].mxu1 %vm1981_vm7, %v5389_v8 }
 0x564   : > { %5697 = vmatprep.mubr.msk.f32.mxu1 %vm5979_vm15, %v5941_v0  ;;  %vm5060_vm15 = vcmask 1042432  }
 0x565   : > { %5381 = vmatmul.mubr.msk.f32.vlgmr.msra.gmra.mrb[4].mxu0 %vm1981_vm7, %v5380_v57  ;;  %v4693_v15 = vpop.permute.xlu1 %4692  ;;  %v5425_v57 = vsel %vm4987_vm1, 1.0, %v5941_v0  ;;  %vm5734_vm2 = vmpackc.low %vm5060_vm15, %vm4986_vm0 }
 0x566   : > { %4387 = vmatpush1.msra.mxu0 %v4378_v9  ;;  %4450 = vmatprep.mubr.f32.mxu0 %v5941_v0  ;;  %v4698_v16 = vsel %vm340_vm5, %v4693_v15, %v4695_v11  ;;  %vm4971_vm5 = vcmp.eq.s32.totalorder %v4937_v62, %v6151_v42  ;;  %v4943_v9 = vadd.s32 184, %v6313_v13  ;;  %v4927_v11 = vadd.s32 56, %v6313_v13 }
 0x567   : > { %4546 = vmatprep.subr.mxu0 %v4539_v10  ;;  %vm5700_vm9 = vmpackc.low %vm4971_vm5, %vm4970_vm4  ;;  %vm4958_vm4 = vcmp.eq.s32.totalorder %v4924_v6, %v6151_v42  ;;  %vm4959_vm5 = vcmp.eq.s32.totalorder %v4925_v7, %v6151_v42  ;;  %v4926_v10 = vadd.s32 48, %v6313_v13  ;;  %v4945_v15 = vadd.s32 200, %v6313_v13 }
 0x56d   : > { %5384 = vmatmul.mubr.msk.f32.vlgmr.msra.gmra.mrb[4].mxu0 %vm1981_vm7, %v5383_v60  ;;  %v5733_v60 = vpack.c.bf16 %v5425_v57, %v5981_v59 }
 0x56e   : > { %4547 = vmatpush1.msra.mxu0 %v4538_v12  ;;  %4610 = vmatprep.mubr.f32.mxu0 %v5941_v0  ;;  %v4854_v44 = vpop.permute.xlu0 %4853 }
 0x56f   : > { %4706 = vmatprep.subr.mxu0 %v4699_v14  ;;  %5735 = vmatpush3.bf16.msk.msra.mxu1 %vm5734_vm2, %v5733_v60  ;;  %vm4975_vm2 = vcmp.eq.s32.totalorder %v4941_v5, %v6151_v42  ;;  %v4944_v14 = vadd.s32 192, %v6313_v13 }
 0x575   : > { %5387 = vmatmul.mubr.msk.f32.vlgmr.msra.gmra.mrb[4].mxu0 %vm1981_vm7, %v5386_v4  ;;  %v4940_v4 = vadd.s32 160, %v6313_v13 }
 0x576   : > { %4707 = vmatpush1.msra.mxu0 %v4698_v16  ;;  %4770 = vmatprep.mubr.f32.mxu0 %v5941_v0  ;;  %v4938_v0 = vadd.s32 144, %v6313_v13 }
 0x577   : > { %5701 = vmatprep.subr.msk.bf16.mxu0 %vm5700_vm9, %v5982_v35  ;;  %vm4974_vm0 = vcmp.eq.s32.totalorder %v4940_v4, %v6151_v42  ;;  %vm4977_vm9 = vcmp.eq.s32.totalorder %v4943_v9, %v6151_v42 }
 0x578   : > { %vm4972_vm10 = vcmp.eq.s32.totalorder %v4938_v0, %v6151_v42  ;;  %vm5708_vm3 = vmpackc.low %vm4975_vm2, %vm4974_vm0 }
 0x579   : > { %vm5704_vm15 = vmpackc.low %vm4973_vm13, %vm4972_vm10 }
 0x57a   : > { %vm5710_vm10 = vmpackc.low %vm4959_vm5, %vm4958_vm4 }
 0x57d   : > { %5390 = vmatmul.mubr.msk.f32.vlgmr.msra.gmra.mrb[4].mxu0 %vm1981_vm7, %v5389_v8  ;;  %vm4957_vm7 = vcmp.eq.s32.totalorder %v4923_v3, %v6151_v42  ;;  %v4942_v8 = vadd.s32 176, %v6313_v13 }
 0x57e   : > { %5703 = vmatpush3.bf16.msk.msra.mxu0 %vm5702_vm6, %v5982_v35  ;;  %vm5706_vm1 = vmpackc.low %vm4957_vm7, %vm4956_vm14  ;;  %vm4960_vm14 = vcmp.eq.s32.totalorder %v4926_v10, %v6151_v42  ;;  %vm4961_vm6 = vcmp.eq.s32.totalorder %v4927_v11, %v6151_v42  ;;  %vm4978_vm7 = vcmp.eq.s32.totalorder %v4944_v14, %v6151_v42 }
 0x57f   : > { %5705 = vmatprep.subr.msk.bf16.mxu0 %vm5704_vm15, %v5982_v35  ;;  %vm4976_vm8 = vcmp.eq.s32.totalorder %v4942_v8, %v6151_v42  ;;  %vm4979_vm15 = vcmp.eq.s32.totalorder %v4945_v15, %v6151_v42  ;;  %vm5714_vm0 = vmpackc.low %vm4961_vm6, %vm4960_vm14 }
 0x580   : > { %vm5712_vm13 = vmpackc.low %vm4977_vm9, %vm4976_vm8 }
 0x582   : > { %5707 = vmatpush3.bf16.msk.msra.mxu0 %vm5706_vm1, %v5982_v35  ;;  %vm5716_vm1 = vmpackc.low %vm4979_vm15, %vm4978_vm7 }
 0x583   : > { %5709 = vmatprep.subr.msk.bf16.mxu0 %vm5708_vm3, %v5982_v35 }
 0x586   : > { %5711 = vmatpush3.bf16.msk.msra.mxu0 %vm5710_vm10, %v5982_v35 }
 0x587   : > { %5713 = vmatprep.subr.msk.bf16.mxu0 %vm5712_vm13, %v5982_v35 }
 0x58a   : > { %5715 = vmatpush3.bf16.msk.msra.mxu0 %vm5714_vm0, %v5982_v35 }
 0x58b   : > { %5717 = vmatprep.subr.msk.bf16.mxu0 %vm5716_vm1, %v5982_v35 }
 0x60e   : > { %v3582_v17 = vpop.f32.mrb[38].mxu1 }
 0x60f   : > { %v5652_v18 = vpop.f32.mrb[39].mxu1 }
 0x610   : > { %v4929_v18 = vadd.s32 72, %v6313_v13 }
 0x612   : > { %vm4963_vm3 = vcmp.eq.s32.totalorder %v4929_v18, %v6151_v42 }
 0x613   : > { %v3726_v19 = vpop.f32.mrb[40].mxu1 }
 0x614   : > { %v3727_v20 = vadd.f32 %v3726_v19, %v3582_v17  ;;  %v5657_v21 = vpop.f32.mrb[41].mxu1  ;;  %v4928_v17 = vadd.s32 64, %v6313_v13  ;;  %v4946_v19 = vadd.s32 208, %v6313_v13 }
 0x615   : > { %v4930_v21 = vadd.s32 80, %v6313_v13 }
 0x616   : > { %vm4962_vm2 = vcmp.eq.s32.totalorder %v4928_v17, %v6151_v42  ;;  %vm4980_vm4 = vcmp.eq.s32.totalorder %v4946_v19, %v6151_v42 }
 0x617   : > { %v3883_v23 = vpop.f32.mrb[42].mxu1  ;;  %vm5718_vm8 = vmpackc.low %vm4963_vm3, %vm4962_vm2  ;;  %vm4964_vm10 = vcmp.eq.s32.totalorder %v4930_v21, %v6151_v42 }
 0x618   : > { %v3889_v24 = vadd.f32 %v3883_v23, %v3727_v20  ;;  %v5662_v39 = vpop.f32.mrb[43].mxu1  ;;  %v4947_v20 = vadd.s32 216, %v6313_v13  ;;  %v4931_v23 = vadd.s32 88, %v6313_v13  ;;  %5719 = vmatpush3.bf16.msk.msra.mxu0 %vm5718_vm8, %v5982_v35 }
 0x619   : > { %v4949_v39 = vadd.s32 232, %v6313_v13 }
 0x61a   : > { %vm4981_vm5 = vcmp.eq.s32.totalorder %v4947_v20, %v6151_v42  ;;  %vm4965_vm13 = vcmp.eq.s32.totalorder %v4931_v23, %v6151_v42 }
 0x61b   : > { %v4043_v41 = vpop.f32.mrb[44].mxu1  ;;  %vm5720_vm9 = vmpackc.low %vm4981_vm5, %vm4980_vm4  ;;  %vm4983_vm6 = vcmp.eq.s32.totalorder %v4949_v39, %v6151_v42 }
 0x61c   : > { %v4049_v25 = vadd.f32 %v4043_v41, %v3889_v24  ;;  %v5667_v46 = vpop.f32.mrb[45].mxu1  ;;  %v4948_v24 = vadd.s32 224, %v6313_v13  ;;  %v4932_v41 = vadd.s32 96, %v6313_v13  ;;  %5721 = vmatprep.subr.msk.bf16.mxu0 %vm5720_vm9, %v5982_v35  ;;  %vm5722_vm7 = vmpackc.low %vm4965_vm13, %vm4964_vm10  ;;  %vm5056_vm13 = vcmask 89088  }
 0x61d   : > { %5723 = vmatpush3.bf16.msk.msra.mxu0 %vm5722_vm7, %v5982_v35  ;;  %v4950_v46 = vadd.s32 240, %v6313_v13 }
 0x61e   : > { %vm4982_vm14 = vcmp.eq.s32.totalorder %v4948_v24, %v6151_v42  ;;  %vm4966_vm0 = vcmp.eq.s32.totalorder %v4932_v41, %v6151_v42 }
 0x61f   : > { %v4203_v26 = vpop.f32.mrb[46].mxu1  ;;  %vm5724_vm15 = vmpackc.low %vm4983_vm6, %vm4982_vm14  ;;  %vm4984_vm3 = vcmp.eq.s32.totalorder %v4950_v46, %v6151_v42 }
 0x620   : > { %v4209_v27 = vadd.f32 %v4203_v26, %v4049_v25  ;;  %v5672_v22 = vpop.f32.mrb[47].mxu1  ;;  %v4933_v25 = vadd.s32 104, %v6313_v13  ;;  %5725 = vmatprep.subr.msk.bf16.mxu0 %vm5724_vm15, %v5982_v35  ;;  %v4951_v26 = vadd.s32 248, %v6313_v13 }
 0x621   : > { %v4935_v22 = vadd.s32 120, %v6313_v13 }
 0x622   : > { %vm4967_vm1 = vcmp.eq.s32.totalorder %v4933_v25, %v6151_v42  ;;  %vm4985_vm4 = vcmp.eq.s32.totalorder %v4951_v26, %v6151_v42 }
 0x623   : > { %vm5726_vm2 = vmpackc.low %vm4967_vm1, %vm4966_vm0  ;;  %vm4969_vm9 = vcmp.eq.s32.totalorder %v4935_v22, %v6151_v42 }
 0x624   : > { %5727 = vmatpush3.bf16.msk.msra.mxu0 %vm5726_vm2, %v5982_v35  ;;  %vm5728_vm5 = vmpackc.low %vm4985_vm4, %vm4984_vm3 }
 0x625   : > { %5729 = vmatprep.subr.msk.bf16.mxu0 %vm5728_vm5, %v5982_v35 }
 0x626   : > { %v4363_v28 = vpop.f32.mrb[48].mxu1 }
 0x627   : > { %v4369_v29 = vadd.f32 %v4363_v28, %v4209_v27  ;;  %v5677_v30 = vpop.f32.mrb[49].mxu1  ;;  %v4934_v27 = vadd.s32 112, %v6313_v13 }
 0x629   : > { %vm4968_vm8 = vcmp.eq.s32.totalorder %v4934_v27, %v6151_v42 }
 0x62a   : > { %v4523_v32 = vpop.f32.mrb[50].mxu1  ;;  %vm5730_vm10 = vmpackc.low %vm4969_vm9, %vm4968_vm8 }
 0x62b   : > { %v4529_v33 = vadd.f32 %v4523_v32, %v4369_v29  ;;  %v5682_v36 = vpop.f32.mrb[51].mxu1  ;;  %5731 = vmatpush3.bf16.msk.msra.mxu0 %vm5730_vm10, %v5982_v35 }
 0x632   : > { %v4683_v37 = vpop.f32.mrb[52].mxu1 }
 0x633   : > { %v4689_v38 = vadd.f32 %v4683_v37, %v4529_v33  ;;  %v5687_v40 = vpop.f32.mrb[53].mxu1 }
 0x636   : > { %v4843_v43 = vpop.f32.mrb[54].mxu1 }
 0x637   : > { %v4849_v45 = vadd.f32 %v4843_v43, %v4689_v38  ;;  %v5692_v34 = vpop.f32.mrb[55].mxu1 }
 0x639   : > { %v6594_v31 = vadd.f32 %v4854_v44, %v4849_v45 }
 0x63b   : > { %v4861_v47 = vmax.f32 %v6594_v31, 0.0 }
 0x63d   : > { %4869 = vrot.lane.b32.xlu0 %v4861_v47, %s5959_s22 }
 0x650   : > { %v4772_v48 = vpop.f32.mrb[4].mxu0 }
 0x651   : > { %v6600_v49 = vadd.f32 %v4854_v44, %v4772_v48  ;;  %v4774_v50 = vpop.f32.mrb[5].mxu0 }
 0x652   : > { %v6602_v51 = vadd.f32 %v4854_v44, %v4774_v50 }
 0x653   : > { %v4859_v54 = vmax.f32 %v6600_v49, 0.0 }
 0x654   : > { %v4860_v56 = vmax.f32 %v6602_v51, 0.0 }
 0x656   : > { %v5866_v58 = vpack.i.bf16 %v4859_v54, %v4860_v56 }
 0x658   : > { %5867 = vrot.lane.b32.xlu1 %v5866_v58, %s5959_s22 }
 0x6af   : > { %v6652_v12 = vpop.permute.xlu0 %4869 }
 0x6b0   : > { %v6661_v16 = vmax.f32 %v4861_v47, %v6652_v12 }
 0x6b2   : > { %4886 = vrot.lane.b32.xlu0 %v6661_v16, %s5958_s21 }
 0x6ca   : > { %v5868_v28 = vpop.permute.xlu1 %5867 }
 0x6cb   : > { %v5870_v29 = vunpack.i.h.bf16 %v5868_v28  ;;  %v5869_v30 = vunpack.i.l.bf16 %v5868_v28 }
 0x6cd   : > { %v4871_v32 = vsel %vm464_vm11, %v5870_v29, %v5869_v30  ;;  %v4872_v13 = vsel %vm464_vm11, %v5869_v30, %v6652_v12  ;;  %vm5204_vm11 = vcmask 523264  }
 0x6ce   : > { %v4876_v33 = vmax.f32 %v4859_v54, %v4871_v32  ;;  %v4877_v36 = vmax.f32 %v4860_v56, %v4872_v13 }
 0x6d0   : > { %v5871_v42 = vpack.i.bf16 %v4876_v33, %v4877_v36 }
 0x6d2   : > { %5872 = vrot.lane.b32.xlu1 %v5871_v42, %s5958_s21  ;;  %s269_s21 = sand.u32 1, %s5931_s25  }
 0x6d3   : > { %s5283_s22 = sshll.u32 %s269_s21, 3  ;;  %s5207_s29 = scalar_lea.sflag [#allocation4], %s269_s21 }
 0x6d4   : > { %s271_s15 = scalar_lea.vmem [#allocation3], %s5283_s22 }
 0x6d5   : > { %s5220_s16 = sshll.u32 %s271_s15, 4  ;;  %s6728_s16 = int_to_ptr.vmem [resolvable:$true] %s5220_s16 }
 0x6d6   : > { %s5877_s8 = scalar_lea.vmem %s6728_s16, 128  ;;  %p5884_p0 = scmp.lt.s32.totalorder %s6728_s16, %s5882_s9 }
 0x6d7   : > { %p5878_p11 = scmp.ne.s32.totalorder %s6728_s16, %s5877_s8  ;;  %p5885_p1 = scmp.lt.s32.totalorder %s5883_s14, %s5877_s8 }
 0x6d9   : > { %p5879_p12 = pnand %p5878_p11, %p6062_p5  ;;  %p5886_p2 = por %p5885_p1, %p5884_p0 }
 0x6db   : > { %p5880_p13 = pneg %p5879_p12 }
 0x6dd   : > { %p5887_p3 = pnand %p5886_p2, %p5880_p13 }
 0x724   : > { %v4887_v37 = vpop.permute.xlu0 %4886 }
 0x725   : > { %v4895_v38 = vmax.f32 %v6661_v16, %v4887_v37 }
 0x727   : > { %5698 = vmatmul.mubr.msk.f32.vlgmr.msra.gmra.mrb[56].mxu1 %vm5056_vm13, %v4895_v38 }
 0x744   : > { %v5873_v40 = vpop.permute.xlu1 %5872 }
 0x745   : > { %v5875_v43 = vunpack.i.h.bf16 %v5873_v40  ;;  %v5874_v45 = vunpack.i.l.bf16 %v5873_v40 }
 0x747   : > { %v4888_v34 = vsel %vm940_vm12, %v5875_v43, %v5874_v45  ;;  %v4889_v44 = vsel %vm940_vm12, %v5874_v45, %v4887_v37 }
 0x748   : > { %v4893_v31 = vmax.f32 %v4876_v33, %v4888_v34  ;;  %v4894_v47 = vmax.f32 %v4877_v36, %v4889_v44 }
 0x74a   : > { %5128 = vmatprep.mubr.f32.mxu0 %v4894_v47 }
 0x74b   : > { %5129 = vmatmul.mubr.f32.vlgmr.msra.gmra.mrb[6].mxu0 %v4893_v31 }
 0x7fa   : > { %v5200_v48 = vpop.f32.mrb[56].mxu1 }
 0x7fb   : > { %v5699_v49 = vpop.f32.mrb[57].mxu1 }
 0x81e   : > { %v5552_v50 = vpop.f32.mrb[6].mxu0 }
 0x81f   : > { %v5553_v51 = vpop.f32.mrb[7].mxu0 }
 0x820   : > { %v5554_v52 = vadd.f32 %v5553_v51, %v5552_v50 }
 0x822   : > { %v5201_v53 = vadd.f32 %v5554_v52, %v5200_v48 }
 0x824   : > { %5205 = vst.msk [vmem:[%s271_s15] sm:$0xff] %vm5204_vm11, %v5201_v53 }
 0x825   : > { %5890 = shalt.err (!%p5887_p3)
}
 0x826   : > { %s5891_s13 = scalar_lea.hbm %s6726_s23, 128  ;;  %s5895_s22 = scalar_lea.hbm %s6775_s7, 256 }
 0x827   : > { %p5892_p4 = scmp.ne.s32.totalorder %s6726_s23, %s5891_s13  ;;  %p5896_p9 = scmp.lt.u32.totalorder %s6726_s23, %s6775_s7 }
 0x828   : > { %p5897_p10 = scmp.lt.u32.totalorder %s5895_s22, %s5891_s13  ;;  %p5899_p12 = scmp.lt.u32.totalorder %s5891_s13, %s6726_s23 }
 0x829   : > { %p5893_p7 = pnand %p5892_p4, %p6062_p5 }
 0x82a   : > { %p5898_p11 = por %p5897_p10, %p5896_p9 }
 0x82b   : > { %p5894_p8 = pneg %p5893_p7 }
 0x82c   : > { %p5900_p13 = por %p5899_p12, %p5898_p11 }
 0x82e   : > { %p5901_p0 = pnand %p5900_p13, %p5894_p8 }
 0x830   : > { %5904 = shalt.err (!%p5901_p0)
}
 0x831   : > { %5784 = dma.vmem_to_hbm [thread:$0]  (%p6062_p5), %s6728_s16, 128, %s6726_s23, %s5207_s29  }
 0x832 PF: > { %p5790_p1 = scmp.ge.s32.totalorder %s5939_s27, 2  ;;  %s5232_s17 = sand.u32 1, %s5927_s24  }
 0x833   : > { %s5233_s18 = scalar_lea.sflag [#allocation4], %s5232_s17 }
 0x834   : > { %p5787_p2 = pnand %p5790_p1, %p6066_p6 }
 0x836   : > { %5922 = dma.done.wait (!%p5787_p2), %s5233_s18, 128  }
 0x837   : > { %5924 = vsyncadd (!%p5787_p2), %s5233_s18, 4294967168  ;;  %p17_p3 = scmp.ge.s32.totalorder %s6049_s30, 4   ;;  %s6781_s24 = smov %s5931_s25 }
 0x838   : > { %s6782_s25 = smov %s5935_s26  ;;  %s6783_s26 = smov %s6060_s10 }
 0x839   : > { %s6784_s27 = smov %s6049_s30  ;;  %19 = sbr.rel (!%p17_p3) target bundleno = 3 (0x3), region = 107 }
 0x840   :  { %5238 = vsyncpa [#allocation4], 1 }
 0x841   :  { %5240 = vsyncpa [#allocation4 + $0x1], 1 }

</bundles_post_ra>
